<compile_context>
chip_gen: v6e
topology: v6e:2x2x1
jax: 0.10.0
libtpu: 0.0.40
codegen_flags: <defaults>
</compile_context>

<pallas_src>
import functools

import jax
import jax.numpy as jnp
import numpy as np
from jax.experimental import pallas as pl
from jax.experimental.pallas import tpu as pltpu

VMEM_SPEC = pl.BlockSpec(memory_space=pltpu.MemorySpace.VMEM)


# ------------------------------ fused kernel ------------------------------- #

def _fused_encoder_kernel(
    # node features + stacked [fwd; rev] slot-index columns
    h_ref, idxd_ref, idxphi_ref, idxpsi_ref, idxa_ref,
    # per-edge scalar extras
    d_ref, phics_ref, psics_ref,
    # int32 segment ids, shape [1, E]
    segd_ref, segphi_ref, segls_ref, sega_ref,
    # MLP parameters (first layers split into per-slot / extra rows)
    wd1h_ref, wd1d_ref, bd1_ref, wd2_ref, bd2_ref,
    wp1h_ref, wp1e_ref, bp1_ref, wp2_ref, bp2_ref,
    wcs1_ref, bcs1_ref, wcs2_ref, bcs2_ref,
    wa1h_ref, wa1r_ref, ba1_ref, wa2_ref, ba2_ref,
    # outputs
    z_ref, psi_edge_ref, z_alpha_ref, pooled_ref):
    f32, bf16 = jnp.float32, jnp.bfloat16
    H = h_ref[...]                                     # [N, F_H]
    num_nodes, F_H = H.shape
    num_graphs = z_ref.shape[0]
    num_LS = pooled_ref.shape[0]

    def relu(v):
        return jnp.maximum(v, 0.0)

    def gather_pre(idx_ref, w1_ref, n_slots):
        """sum_s onehot(idx[:, s]) @ (H @ W1_slot_s) for stacked [fwd; rev] rows."""
        idx = idx_ref[...]                             # [2E, S] int32
        rows2 = idx.shape[0]
        lane_n = jax.lax.broadcasted_iota(jnp.int32, (rows2, num_nodes), 1)
        w1 = w1_ref[...]
        pre = None
        for s in range(n_slots):
            p_s = jnp.dot(H, w1[s * F_H:(s + 1) * F_H, :],
                          preferred_element_type=f32)               # [N, hidden]
            onehot = (idx[:, s:s + 1] == lane_n).astype(f32).astype(bf16)
            term = jnp.dot(onehot, p_s.astype(bf16),
                           preferred_element_type=f32)              # [2E, hidden]
            pre = term if pre is None else pre + term
        return pre

    def second(h_sum, w2_ref, b2_ref, cast=True):
        w2 = w2_ref[...]
        if cast:
            y = jnp.dot(h_sum.astype(bf16), w2.astype(bf16),
                        preferred_element_type=f32)
        else:
            y = jnp.dot(h_sum, w2, preferred_element_type=f32)
        return y + 2.0 * b2_ref[...]                   # fwd + rev share b2

    def add_pool(seg_ref, num_seg, x):
        # assumes seg ids in [0, num_seg); out-of-range rows are dropped
        ids = seg_ref[...]                             # [1, E]
        rows = jax.lax.broadcasted_iota(jnp.int32, (num_seg, ids.shape[1]), 0)
        return jnp.dot((ids == rows).astype(f32), x, preferred_element_type=f32)

    # ----------------------------- distance branch -------------------------- #
    E_d = d_ref.shape[0]
    pre_d = gather_pre(idxd_ref, wd1h_ref, 2) + bd1_ref[...]        # [2E_d, hid]
    d_term = d_ref[...] * wd1d_ref[...]                             # [E_d, hid]
    h_d = relu(pre_d[:E_d] + d_term) + relu(pre_d[E_d:] + d_term)
    z_d_edge = second(h_d, wd2_ref, bd2_ref)                        # [E_d, F_zD]

    # ------------------------------- phi branch ----------------------------- #
    E_phi = phics_ref.shape[0]
    phics = phics_ref[...]
    pre_phi = gather_pre(idxphi_ref, wp1h_ref, 3) + bp1_ref[...]
    phi_term = (phics[:, 0:1] * wp1e_ref[0:1, :]
                + phics[:, 1:2] * wp1e_ref[1:2, :])                 # [E_phi, hid]
    h_phi = relu(pre_phi[:E_phi] + phi_term) + relu(pre_phi[E_phi:] + phi_term)
    z_phi_edge = second(h_phi, wp2_ref, bp2_ref)                    # [E_phi, F_zphi]

    # ------------------ psi branch (fused c | sinusoidal shift) ------------- #
    E_psi = psics_ref.shape[0]
    pre_cs = gather_pre(idxpsi_ref, wcs1_ref, 4) + bcs1_ref[...]    # [2E_psi, 2*hid]
    h_cs = relu(pre_cs[:E_psi]) + relu(pre_cs[E_psi:])
    y_cs = second(h_cs, wcs2_ref, bcs2_ref, cast=False)             # [E_psi, 3]
    c_tensor = y_cs[:, 0:1]
    shift = y_cs[:, 1:3]
    norm = jnp.sqrt(jnp.sum(shift * shift, axis=1, keepdims=True))
    nshift = shift / jnp.maximum(norm, 1e-12)
    pc = nshift[:, 0:1]
    ps = nshift[:, 1:2]
    nc = jax.nn.sigmoid(c_tensor)
    cosp = psics_ref[:, 0:1]
    sinp = psics_ref[:, 1:2]
    lane2 = jax.lax.broadcasted_iota(jnp.int32, (E_psi, 2), 1)
    scaled = jnp.where(lane2 == 0,
                       cosp * pc - sinp * ps,
                       sinp * pc + cosp * ps) * nc                  # [E_psi, 2]
    pooled = add_pool(segls_ref, num_LS, scaled)                    # [num_LS, 2]
    radii = jnp.sqrt(jnp.sum(pooled * pooled, axis=1, keepdims=True))

    # -------------- alpha branch: radii folded in as rank-1 update ---------- #
    pre_a = gather_pre(idxa_ref, wa1h_ref, 2) + ba1_ref[...]        # [2L, hid]
    rad_term = radii * wa1r_ref[...]                                # [L, hid]
    h_a = relu(pre_a[:num_LS] + rad_term) + relu(pre_a[num_LS:] + rad_term)
    z_alpha = second(h_a, wa2_ref, ba2_ref)                         # [L, F_za]

    # ------------ graph-level add-pool + packed column-slice stores --------- #
    F_zD = wd2_ref.shape[1]
    F_zphi = wp2_ref.shape[1]
    F_za = wa2_ref.shape[1]
    z_ref[:, 0:F_zD] = add_pool(segd_ref, num_graphs, z_d_edge)
    z_ref[:, F_zD:F_zD + F_zphi] = add_pool(segphi_ref, num_graphs, z_phi_edge)
    z_ref[:, F_zD + F_zphi:F_zD + F_zphi + F_za] = add_pool(sega_ref, num_graphs,
                                                            z_alpha)

    psi_edge_ref[:, 0:1] = norm
    psi_edge_ref[:, 1:2] = c_tensor
    psi_edge_ref[:, 2:3] = pc
    psi_edge_ref[:, 3:4] = ps
    z_alpha_ref[...] = z_alpha
    pooled_ref[...] = pooled


# --------------------------- forward pass wrapper --------------------------- #

def _stack_fwd_rev(idx):
    """[S, E] slot rows -> [2E, S] index columns: forward rows then reverse rows."""
    fwd = idx.T
    rev = idx[::-1].T
    return jnp.concatenate([fwd, rev], axis=0).astype(jnp.int32)


@functools.partial(jax.jit, static_argnames=("num_graphs",))
def internal_coordinate_encoder_forward(params, H, distances, distance_indices,
                                        phis, phi_indices, psis, psi_indices,
                                        node_map, LS_map, alpha_indices,
                                        num_graphs):
    f32 = jnp.float32
    num_nodes, F_H = H.shape
    E_d, E_phi, E_psi = distances.shape[0], phis.shape[0], psis.shape[0]
    num_LS = alpha_indices.shape[1]

    idx_d = _stack_fwd_rev(distance_indices)          # [2E_d, 2]
    idx_phi = _stack_fwd_rev(phi_indices)             # [2E_phi, 3]
    idx_psi = _stack_fwd_rev(psi_indices)             # [2E_psi, 4]
    idx_a = _stack_fwd_rev(alpha_indices)             # [2*num_LS, 2]

    d_col = distances.astype(f32)[:, None]
    phi_cs = jnp.stack([jnp.cos(phis), jnp.sin(phis)], axis=1).astype(f32)
    psi_cs = jnp.stack([jnp.cos(psis), jnp.sin(psis)], axis=1).astype(f32)

    seg_d = node_map[distance_indices[0]][None, :].astype(jnp.int32)
    seg_phi = node_map[phi_indices[0]][None, :].astype(jnp.int32)
    seg_ls = LS_map[None, :].astype(jnp.int32)
    seg_a = node_map[alpha_indices[0]][None, :].astype(jnp.int32)

    wd1, bd1, wd2, bd2 = params['D']
    wp1, bp1, wp2, bp2 = params['phi']
    wc1, bc1, wc2, bc2 = params['c']
    ws1, bs1, ws2, bs2 = params['shift']
    wa1, ba1, wa2, ba2 = params['alpha']
    hidden = wd1.shape[1]

    wd1_h, wd1_d = wd1[:2 * F_H], wd1[2 * F_H:]       # H-slots / distance row
    wp1_h, wp1_e = wp1[:3 * F_H], wp1[3 * F_H:]       # H-slots / [cos, sin] rows
    wa1_h, wa1_r = wa1[:2 * F_H], wa1[2 * F_H:]       # H-slots / radii row

    # fuse c / sinusoidal-shift: one first-layer pass, block-diagonal second layer
    wcs1 = jnp.concatenate([wc1, ws1], axis=1)        # [4F_H, 2*hidden]
    bcs1 = jnp.concatenate([bc1, bs1], axis=1)        # [1, 2*hidden]
    wcs2 = jnp.zeros((2 * hidden, 3), f32)
    wcs2 = wcs2.at[:hidden, 0:1].set(wc2).at[hidden:, 1:3].set(ws2)
    bcs2 = jnp.concatenate([bc2, bs2], axis=1)        # [1, 3]

    F_zD, F_zphi, F_za = wd2.shape[1], wp2.shape[1], wa2.shape[1]

    kernel_inputs = (H, idx_d, idx_phi, idx_psi, idx_a,
                     d_col, phi_cs, psi_cs,
                     seg_d, seg_phi, seg_ls, seg_a,
                     wd1_h, wd1_d, bd1, wd2, bd2,
                     wp1_h, wp1_e, bp1, wp2, bp2,
                     wcs1, bcs1, wcs2, bcs2,
                     wa1_h, wa1_r, ba1, wa2, ba2)

    out_shapes = (
        jax.ShapeDtypeStruct((num_graphs, F_zD + F_zphi + F_za), f32),
        jax.ShapeDtypeStruct((E_psi, 4), f32),        # [norm | c | cos | sin]
        jax.ShapeDtypeStruct((num_LS, F_za), f32),
        jax.ShapeDtypeStruct((num_LS, 2), f32),
    )

    mm = lambda m, k, n: 2 * m * k * n
    flops = (
        mm(num_nodes, F_H, hidden) * (2 + 3 + 2) + mm(num_nodes, F_H, 2 * hidden) * 4
        + mm(2 * E_d, num_nodes, hidden) * 2
        + mm(2 * E_phi, num_nodes, hidden) * 3
        + mm(2 * E_psi, num_nodes, 2 * hidden) * 4
        + mm(2 * num_LS, num_nodes, hidden) * 2
        + mm(E_d, hidden, F_zD) + mm(E_phi, hidden, F_zphi)
        + mm(E_psi, 2 * hidden, 3) + mm(num_LS, hidden, F_za)
        + mm(num_graphs, E_d, F_zD) + mm(num_graphs, E_phi, F_zphi)
        + mm(num_graphs, num_LS, F_za) + mm(num_LS, E_psi, 2))
    bytes_accessed = int(sum(4 * int(np.prod(a.shape)) for a in kernel_inputs)
                         + sum(4 * int(np.prod(s.shape)) for s in out_shapes))
    cost = pl.CostEstimate(flops=int(flops), transcendentals=int(E_psi),
                           bytes_accessed=bytes_accessed)

    z, psi_edge, z_alpha, pooled_sums = pl.pallas_call(
        _fused_encoder_kernel,
        out_shape=out_shapes,
        in_specs=[VMEM_SPEC] * len(kernel_inputs),
        out_specs=(VMEM_SPEC,) * 4,
        compiler_params=pltpu.CompilerParams(vmem_limit_bytes=32 * 1024 * 1024),
        cost_estimate=cost,
    )(*kernel_inputs)

    phase_shift_norm = psi_edge[:, 0:1]
    c_tensor = psi_edge[:, 1:2]
    phase_cos = psi_edge[:, 2]
    phase_sin = psi_edge[:, 3]
    return (z, phase_shift_norm, z_alpha, c_tensor, phase_cos, phase_sin,
            psi_cs, pooled_sums)


# ----------------------------- pure-JAX reference --------------------------- #

def _mlp2_ref(x, params):
    w1, b1, w2, b2 = params
    return jnp.maximum(x @ w1 + b1, 0.0) @ w2 + b2


def _forward_ref(params, H, distances, distance_indices, phis, phi_indices,
                 psis, psi_indices, node_map, LS_map, alpha_indices, num_graphs):
    i, j = distance_indices
    d = distances[:, None]
    z_D = (_mlp2_ref(jnp.concatenate([H[i], H[j], d], 1), params['D'])
           + _mlp2_ref(jnp.concatenate([H[j], H[i], d], 1), params['D']))
    i, j, k = phi_indices
    cphi, sphi = jnp.cos(phis)[:, None], jnp.sin(phis)[:, None]
    z_phi = (_mlp2_ref(jnp.concatenate([H[i], H[j], H[k], cphi, sphi], 1), params['phi'])
             + _mlp2_ref(jnp.concatenate([H[k], H[j], H[i], cphi, sphi], 1), params['phi']))
    i, j, k, l = psi_indices
    qf = jnp.concatenate([H[i], H[j], H[k], H[l]], 1)
    qr = jnp.concatenate([H[l], H[k], H[j], H[i]], 1)
    c_tensor = _mlp2_ref(qf, params['c']) + _mlp2_ref(qr, params['c'])
    shift = _mlp2_ref(qf, params['shift']) + _mlp2_ref(qr, params['shift'])
    norm = jnp.linalg.norm(shift, ord=2, axis=1, keepdims=True)
    nshift = shift / jnp.maximum(norm, 1e-12)
    pc, ps = nshift[:, 0:1], nshift[:, 1:2]
    nc = jax.nn.sigmoid(c_tensor)
    cpsi, spsi = jnp.cos(psis)[:, None], jnp.sin(psis)[:, None]
    st = jnp.concatenate([cpsi * pc - spsi * ps, spsi * pc + cpsi * ps], 1) * nc
    num_LS = alpha_indices.shape[1]
    pooled = jax.ops.segment_sum(st, LS_map, num_segments=num_LS)
    radii = jnp.linalg.norm(pooled, ord=2, axis=1, keepdims=True)
    x, y = alpha_indices
    z_alpha = (_mlp2_ref(jnp.concatenate([H[x], H[y], radii], 1), params['alpha'])
               + _mlp2_ref(jnp.concatenate([H[y], H[x], radii], 1), params['alpha']))
    zdp = jax.ops.segment_sum(z_D, node_map[distance_indices[0]], num_segments=num_graphs)
    zpp = jax.ops.segment_sum(z_phi, node_map[phi_indices[0]], num_segments=num_graphs)
    zap = jax.ops.segment_sum(z_alpha, node_map[alpha_indices[0]], num_segments=num_graphs)
    z = jnp.concatenate([zdp, zpp, zap], 1)
    return z, pooled, norm, z_alpha, c_tensor, nshift


# ---------------------------------- main ------------------------------------ #

def init_mlp(key, din, hidden, dout):
    k1, k2, k3, k4 = jax.random.split(key, 4)
    w1 = jax.random.normal(k1, (din, hidden), jnp.float32) * 0.1
    b1 = jax.random.normal(k2, (1, hidden), jnp.float32) * 0.1
    w2 = jax.random.normal(k3, (hidden, dout), jnp.float32) * 0.1
    b2 = jax.random.normal(k4, (1, dout), jnp.float32) * 0.1
    return (w1, b1, w2, b2)


if __name__ == "__main__":
    key = jax.random.PRNGKey(0)
    F_H = 8
    F_z_list = [16, 16, 16]
    hidden = 128          # lane-aligned hidden width (MXU N = 128)
    N = 8                 # nodes
    num_graphs = 2
    E_d = E_phi = E_psi = 8
    num_LS = 4            # LS groups == number of alpha pairs

    keys = jax.random.split(key, 10)
    params = {
        'D':     init_mlp(keys[0], 2 * F_H + 1, hidden, F_z_list[0]),
        'phi':   init_mlp(keys[1], 3 * F_H + 2, hidden, F_z_list[1]),
        'c':     init_mlp(keys[2], 4 * F_H,     hidden, 1),
        'shift': init_mlp(keys[3], 4 * F_H,     hidden, 2),
        'alpha': init_mlp(keys[4], 2 * F_H + 1, hidden, F_z_list[2]),
    }

    H = jax.random.normal(keys[5], (N, F_H), jnp.float32)
    distances = jax.random.uniform(keys[6], (E_d,), jnp.float32, 0.5, 3.0)
    phis = jax.random.uniform(keys[7], (E_phi,), jnp.float32, -np.pi, np.pi)
    psis = jax.random.uniform(keys[8], (E_psi,), jnp.float32, -np.pi, np.pi)

    distance_indices = jnp.array([[0, 1, 2, 3, 4, 5, 6, 7],
                                  [1, 2, 3, 0, 5, 6, 7, 4]], dtype=jnp.int32)
    phi_indices = jnp.array([[0, 1, 2, 3, 4, 5, 6, 7],
                             [1, 2, 3, 0, 5, 6, 7, 4],
                             [2, 3, 0, 1, 6, 7, 4, 5]], dtype=jnp.int32)
    psi_indices = jnp.array([[0, 1, 2, 3, 4, 5, 6, 7],
                             [1, 2, 3, 0, 5, 6, 7, 4],
                             [2, 3, 0, 1, 6, 7, 4, 5],
                             [3, 0, 1, 2, 7, 4, 5, 6]], dtype=jnp.int32)
    node_map = jnp.array([0, 0, 0, 0, 1, 1, 1, 1], dtype=jnp.int32)
    LS_map = jnp.array([0, 0, 1, 1, 2, 2, 3, 3], dtype=jnp.int32)
    alpha_indices = jnp.array([[0, 2, 4, 6],
                               [1, 3, 5, 7]], dtype=jnp.int32)

    out = internal_coordinate_encoder_forward(
        params, H, distances, distance_indices, phis, phi_indices,
        psis, psi_indices, node_map, LS_map, alpha_indices, num_graphs)
    out = jax.block_until_ready(out)

    (z, phase_shift_norm, z_alpha, c_tensor,
     phase_cos, phase_sin, psi_cs, pooled_sums) = out

    # sanity check against a pure-f32 JAX reference
    (z_ref, pooled_ref, norm_ref, z_alpha_ref,
     c_ref, nshift_ref) = _forward_ref(
        params, H, distances, distance_indices, phis, phi_indices,
        psis, psi_indices, node_map, LS_map, alpha_indices, num_graphs)

    assert z.shape == (num_graphs, sum(F_z_list))
    assert pooled_sums.shape == (num_LS, 2)
    assert z_alpha.shape == (num_LS, F_z_list[2])

    # tolerance sized for bf16 MXU operands with f32 accumulation
    tol = dict(rtol=3e-2, atol=3e-2)
    assert np.allclose(np.asarray(z), np.asarray(z_ref), **tol)
    assert np.allclose(np.asarray(pooled_sums), np.asarray(pooled_ref), **tol)
    assert np.allclose(np.asarray(phase_shift_norm), np.asarray(norm_ref), **tol)
    assert np.allclose(np.asarray(z_alpha), np.asarray(z_alpha_ref), **tol)
    assert np.allclose(np.asarray(c_tensor), np.asarray(c_ref), **tol)
    # unit-vector components: error is amplified by 1/||shift|| when the raw shift
    # vector is near zero (the module's eps-guarded division), so use a wider atol.
    assert np.allclose(np.asarray(phase_cos), np.asarray(nshift_ref[:, 0]), atol=1e-1)
    assert np.allclose(np.asarray(phase_sin), np.asarray(nshift_ref[:, 1]), atol=1e-1)

    print("KERNEL_OK")
</pallas_src>

<mosaic_0001>
module attributes {stable_mosaic.version = 11 : i64} {
  func.func @_fused_encoder_kernel(%arg0: memref<8x8xf32, #tpu.memory_space<vmem>>, %arg1: memref<16x2xi32, #tpu.memory_space<vmem>>, %arg2: memref<16x3xi32, #tpu.memory_space<vmem>>, %arg3: memref<16x4xi32, #tpu.memory_space<vmem>>, %arg4: memref<8x2xi32, #tpu.memory_space<vmem>>, %arg5: memref<8x1xf32, #tpu.memory_space<vmem>>, %arg6: memref<8x2xf32, #tpu.memory_space<vmem>>, %arg7: memref<8x2xf32, #tpu.memory_space<vmem>>, %arg8: memref<1x8xi32, #tpu.memory_space<vmem>>, %arg9: memref<1x8xi32, #tpu.memory_space<vmem>>, %arg10: memref<1x8xi32, #tpu.memory_space<vmem>>, %arg11: memref<1x4xi32, #tpu.memory_space<vmem>>, %arg12: memref<16x128xf32, #tpu.memory_space<vmem>>, %arg13: memref<1x128xf32, #tpu.memory_space<vmem>>, %arg14: memref<1x128xf32, #tpu.memory_space<vmem>>, %arg15: memref<128x16xf32, #tpu.memory_space<vmem>>, %arg16: memref<1x16xf32, #tpu.memory_space<vmem>>, %arg17: memref<24x128xf32, #tpu.memory_space<vmem>>, %arg18: memref<2x128xf32, #tpu.memory_space<vmem>>, %arg19: memref<1x128xf32, #tpu.memory_space<vmem>>, %arg20: memref<128x16xf32, #tpu.memory_space<vmem>>, %arg21: memref<1x16xf32, #tpu.memory_space<vmem>>, %arg22: memref<32x256xf32, #tpu.memory_space<vmem>>, %arg23: memref<1x256xf32, #tpu.memory_space<vmem>>, %arg24: memref<256x3xf32, #tpu.memory_space<vmem>>, %arg25: memref<1x3xf32, #tpu.memory_space<vmem>>, %arg26: memref<16x128xf32, #tpu.memory_space<vmem>>, %arg27: memref<1x128xf32, #tpu.memory_space<vmem>>, %arg28: memref<1x128xf32, #tpu.memory_space<vmem>>, %arg29: memref<128x16xf32, #tpu.memory_space<vmem>>, %arg30: memref<1x16xf32, #tpu.memory_space<vmem>>, %arg31: memref<2x48xf32, #tpu.memory_space<vmem>>, %arg32: memref<8x4xf32, #tpu.memory_space<vmem>>, %arg33: memref<4x16xf32, #tpu.memory_space<vmem>>, %arg34: memref<4x2xf32, #tpu.memory_space<vmem>>) attributes {dimension_semantics = [], scalar_prefetch = 0 : i64, scratch_operands = 0 : i64, tpu.core_type = #tpu.core_type<tc>} {
    %c0 = arith.constant 0 : index
    %c0_0 = arith.constant 0 : index
    %0 = vector.load %arg0[%c0, %c0_0] : memref<8x8xf32, #tpu.memory_space<vmem>>, vector<8x8xf32>
    %c0_1 = arith.constant 0 : index
    %c0_2 = arith.constant 0 : index
    %1 = vector.load %arg1[%c0_1, %c0_2] : memref<16x2xi32, #tpu.memory_space<vmem>>, vector<16x2xi32>
    %2 = tpu.iota {dimensions = array<i32: 1>} : vector<16x8xi32>
    %c0_3 = arith.constant 0 : index
    %c0_4 = arith.constant 0 : index
    %3 = vector.load %arg12[%c0_3, %c0_4] : memref<16x128xf32, #tpu.memory_space<vmem>>, vector<16x128xf32>
    %4 = vector.extract_strided_slice %3 {offsets = [0, 0], sizes = [8, 128], strides = [1, 1]} : vector<16x128xf32> to vector<8x128xf32>
    %cst = arith.constant dense<0.000000e+00> : vector<8x128xf32>
    %5 = tpu.matmul %0, %4, %cst {dimension_numbers = #tpu.dot_dimension_numbers<[1], [0], [0], [1], [0, 0, 1, 1], [], []>} : vector<8x8xf32>, vector<8x128xf32>, vector<8x128xf32> -> vector<8x128xf32>
    %6 = vector.extract_strided_slice %1 {offsets = [0, 0], sizes = [16, 1], strides = [1, 1]} : vector<16x2xi32> to vector<16x1xi32>
    %7 = vector.broadcast %6 : vector<16x1xi32> to vector<16x8xi32>
    %8 = arith.cmpi eq, %7, %2 : vector<16x8xi32>
    %9 = arith.extui %8 : vector<16x8xi1> to vector<16x8xi32>
    %10 = arith.sitofp %9 : vector<16x8xi32> to vector<16x8xf32>
    %11 = arith.truncf %10 : vector<16x8xf32> to vector<16x8xbf16>
    %12 = arith.truncf %5 : vector<8x128xf32> to vector<8x128xbf16>
    %cst_5 = arith.constant dense<0.000000e+00> : vector<16x128xf32>
    %13 = tpu.matmul %11, %12, %cst_5 {dimension_numbers = #tpu.dot_dimension_numbers<[1], [0], [0], [1], [0, 0, 1, 1], [], []>} : vector<16x8xbf16>, vector<8x128xbf16>, vector<16x128xf32> -> vector<16x128xf32>
    %14 = vector.extract_strided_slice %3 {offsets = [8, 0], sizes = [8, 128], strides = [1, 1]} : vector<16x128xf32> to vector<8x128xf32>
    %cst_6 = arith.constant dense<0.000000e+00> : vector<8x128xf32>
    %15 = tpu.matmul %0, %14, %cst_6 {dimension_numbers = #tpu.dot_dimension_numbers<[1], [0], [0], [1], [0, 0, 1, 1], [], []>} : vector<8x8xf32>, vector<8x128xf32>, vector<8x128xf32> -> vector<8x128xf32>
    %16 = vector.extract_strided_slice %1 {offsets = [0, 1], sizes = [16, 1], strides = [1, 1]} : vector<16x2xi32> to vector<16x1xi32>
    %17 = vector.broadcast %16 : vector<16x1xi32> to vector<16x8xi32>
    %18 = arith.cmpi eq, %17, %2 : vector<16x8xi32>
    %19 = arith.extui %18 : vector<16x8xi1> to vector<16x8xi32>
    %20 = arith.sitofp %19 : vector<16x8xi32> to vector<16x8xf32>
    %21 = arith.truncf %20 : vector<16x8xf32> to vector<16x8xbf16>
    %22 = arith.truncf %15 : vector<8x128xf32> to vector<8x128xbf16>
    %cst_7 = arith.constant dense<0.000000e+00> : vector<16x128xf32>
    %23 = tpu.matmul %21, %22, %cst_7 {dimension_numbers = #tpu.dot_dimension_numbers<[1], [0], [0], [1], [0, 0, 1, 1], [], []>} : vector<16x8xbf16>, vector<8x128xbf16>, vector<16x128xf32> -> vector<16x128xf32>
    %24 = arith.addf %13, %23 : vector<16x128xf32>
    %c0_8 = arith.constant 0 : index
    %c0_9 = arith.constant 0 : index
    %25 = vector.load %arg14[%c0_8, %c0_9] : memref<1x128xf32, #tpu.memory_space<vmem>>, vector<1x128xf32>
    %26 = vector.broadcast %25 : vector<1x128xf32> to vector<16x128xf32>
    %27 = arith.addf %24, %26 : vector<16x128xf32>
    %c0_10 = arith.constant 0 : index
    %c0_11 = arith.constant 0 : index
    %28 = vector.load %arg5[%c0_10, %c0_11] : memref<8x1xf32, #tpu.memory_space<vmem>>, vector<8x1xf32>
    %c0_12 = arith.constant 0 : index
    %c0_13 = arith.constant 0 : index
    %29 = vector.load %arg13[%c0_12, %c0_13] : memref<1x128xf32, #tpu.memory_space<vmem>>, vector<1x128xf32>
    %30 = vector.broadcast %28 : vector<8x1xf32> to vector<8x128xf32>
    %31 = vector.broadcast %29 : vector<1x128xf32> to vector<8x128xf32>
    %32 = arith.mulf %30, %31 : vector<8x128xf32>
    %33 = vector.extract_strided_slice %27 {offsets = [0, 0], sizes = [8, 128], strides = [1, 1]} : vector<16x128xf32> to vector<8x128xf32>
    %34 = arith.addf %33, %32 : vector<8x128xf32>
    %cst_14 = arith.constant 0.000000e+00 : f32
    %35 = vector.broadcast %cst_14 : f32 to vector<8x128xf32>
    %36 = arith.maximumf %34, %35 : vector<8x128xf32>
    %37 = vector.extract_strided_slice %27 {offsets = [8, 0], sizes = [8, 128], strides = [1, 1]} : vector<16x128xf32> to vector<8x128xf32>
    %38 = arith.addf %37, %32 : vector<8x128xf32>
    %cst_15 = arith.constant 0.000000e+00 : f32
    %39 = vector.broadcast %cst_15 : f32 to vector<8x128xf32>
    %40 = arith.maximumf %38, %39 : vector<8x128xf32>
    %41 = arith.addf %36, %40 : vector<8x128xf32>
    %c0_16 = arith.constant 0 : index
    %c0_17 = arith.constant 0 : index
    %42 = vector.load %arg15[%c0_16, %c0_17] : memref<128x16xf32, #tpu.memory_space<vmem>>, vector<128x16xf32>
    %43 = arith.truncf %41 : vector<8x128xf32> to vector<8x128xbf16>
    %44 = arith.truncf %42 : vector<128x16xf32> to vector<128x16xbf16>
    %cst_18 = arith.constant dense<0.000000e+00> : vector<8x16xf32>
    %45 = tpu.matmul %43, %44, %cst_18 {dimension_numbers = #tpu.dot_dimension_numbers<[1], [0], [0], [1], [0, 0, 1, 1], [], []>} : vector<8x128xbf16>, vector<128x16xbf16>, vector<8x16xf32> -> vector<8x16xf32>
    %c0_19 = arith.constant 0 : index
    %c0_20 = arith.constant 0 : index
    %46 = vector.load %arg16[%c0_19, %c0_20] : memref<1x16xf32, #tpu.memory_space<vmem>>, vector<1x16xf32>
    %cst_21 = arith.constant 2.000000e+00 : f32
    %47 = vector.broadcast %cst_21 : f32 to vector<1x16xf32>
    %48 = arith.mulf %47, %46 : vector<1x16xf32>
    %49 = vector.broadcast %48 : vector<1x16xf32> to vector<8x16xf32>
    %50 = arith.addf %45, %49 : vector<8x16xf32>
    %c0_22 = arith.constant 0 : index
    %c0_23 = arith.constant 0 : index
    %51 = vector.load %arg6[%c0_22, %c0_23] : memref<8x2xf32, #tpu.memory_space<vmem>>, vector<8x2xf32>
    %c0_24 = arith.constant 0 : index
    %c0_25 = arith.constant 0 : index
    %52 = vector.load %arg2[%c0_24, %c0_25] : memref<16x3xi32, #tpu.memory_space<vmem>>, vector<16x3xi32>
    %53 = tpu.iota {dimensions = array<i32: 1>} : vector<16x8xi32>
    %c0_26 = arith.constant 0 : index
    %c0_27 = arith.constant 0 : index
    %54 = vector.load %arg17[%c0_26, %c0_27] : memref<24x128xf32, #tpu.memory_space<vmem>>, vector<24x128xf32>
    %55 = vector.extract_strided_slice %54 {offsets = [0, 0], sizes = [8, 128], strides = [1, 1]} : vector<24x128xf32> to vector<8x128xf32>
    %cst_28 = arith.constant dense<0.000000e+00> : vector<8x128xf32>
    %56 = tpu.matmul %0, %55, %cst_28 {dimension_numbers = #tpu.dot_dimension_numbers<[1], [0], [0], [1], [0, 0, 1, 1], [], []>} : vector<8x8xf32>, vector<8x128xf32>, vector<8x128xf32> -> vector<8x128xf32>
    %57 = vector.extract_strided_slice %52 {offsets = [0, 0], sizes = [16, 1], strides = [1, 1]} : vector<16x3xi32> to vector<16x1xi32>
    %58 = vector.broadcast %57 : vector<16x1xi32> to vector<16x8xi32>
    %59 = arith.cmpi eq, %58, %53 : vector<16x8xi32>
    %60 = arith.extui %59 : vector<16x8xi1> to vector<16x8xi32>
    %61 = arith.sitofp %60 : vector<16x8xi32> to vector<16x8xf32>
    %62 = arith.truncf %61 : vector<16x8xf32> to vector<16x8xbf16>
    %63 = arith.truncf %56 : vector<8x128xf32> to vector<8x128xbf16>
    %cst_29 = arith.constant dense<0.000000e+00> : vector<16x128xf32>
    %64 = tpu.matmul %62, %63, %cst_29 {dimension_numbers = #tpu.dot_dimension_numbers<[1], [0], [0], [1], [0, 0, 1, 1], [], []>} : vector<16x8xbf16>, vector<8x128xbf16>, vector<16x128xf32> -> vector<16x128xf32>
    %65 = vector.extract_strided_slice %54 {offsets = [8, 0], sizes = [8, 128], strides = [1, 1]} : vector<24x128xf32> to vector<8x128xf32>
    %cst_30 = arith.constant dense<0.000000e+00> : vector<8x128xf32>
    %66 = tpu.matmul %0, %65, %cst_30 {dimension_numbers = #tpu.dot_dimension_numbers<[1], [0], [0], [1], [0, 0, 1, 1], [], []>} : vector<8x8xf32>, vector<8x128xf32>, vector<8x128xf32> -> vector<8x128xf32>
    %67 = vector.extract_strided_slice %52 {offsets = [0, 1], sizes = [16, 1], strides = [1, 1]} : vector<16x3xi32> to vector<16x1xi32>
    %68 = vector.broadcast %67 : vector<16x1xi32> to vector<16x8xi32>
    %69 = arith.cmpi eq, %68, %53 : vector<16x8xi32>
    %70 = arith.extui %69 : vector<16x8xi1> to vector<16x8xi32>
    %71 = arith.sitofp %70 : vector<16x8xi32> to vector<16x8xf32>
    %72 = arith.truncf %71 : vector<16x8xf32> to vector<16x8xbf16>
    %73 = arith.truncf %66 : vector<8x128xf32> to vector<8x128xbf16>
    %cst_31 = arith.constant dense<0.000000e+00> : vector<16x128xf32>
    %74 = tpu.matmul %72, %73, %cst_31 {dimension_numbers = #tpu.dot_dimension_numbers<[1], [0], [0], [1], [0, 0, 1, 1], [], []>} : vector<16x8xbf16>, vector<8x128xbf16>, vector<16x128xf32> -> vector<16x128xf32>
    %75 = arith.addf %64, %74 : vector<16x128xf32>
    %76 = vector.extract_strided_slice %54 {offsets = [16, 0], sizes = [8, 128], strides = [1, 1]} : vector<24x128xf32> to vector<8x128xf32>
    %cst_32 = arith.constant dense<0.000000e+00> : vector<8x128xf32>
    %77 = tpu.matmul %0, %76, %cst_32 {dimension_numbers = #tpu.dot_dimension_numbers<[1], [0], [0], [1], [0, 0, 1, 1], [], []>} : vector<8x8xf32>, vector<8x128xf32>, vector<8x128xf32> -> vector<8x128xf32>
    %78 = vector.extract_strided_slice %52 {offsets = [0, 2], sizes = [16, 1], strides = [1, 1]} : vector<16x3xi32> to vector<16x1xi32>
    %79 = vector.broadcast %78 : vector<16x1xi32> to vector<16x8xi32>
    %80 = arith.cmpi eq, %79, %53 : vector<16x8xi32>
    %81 = arith.extui %80 : vector<16x8xi1> to vector<16x8xi32>
    %82 = arith.sitofp %81 : vector<16x8xi32> to vector<16x8xf32>
    %83 = arith.truncf %82 : vector<16x8xf32> to vector<16x8xbf16>
    %84 = arith.truncf %77 : vector<8x128xf32> to vector<8x128xbf16>
    %cst_33 = arith.constant dense<0.000000e+00> : vector<16x128xf32>
    %85 = tpu.matmul %83, %84, %cst_33 {dimension_numbers = #tpu.dot_dimension_numbers<[1], [0], [0], [1], [0, 0, 1, 1], [], []>} : vector<16x8xbf16>, vector<8x128xbf16>, vector<16x128xf32> -> vector<16x128xf32>
    %86 = arith.addf %75, %85 : vector<16x128xf32>
    %c0_34 = arith.constant 0 : index
    %c0_35 = arith.constant 0 : index
    %87 = vector.load %arg19[%c0_34, %c0_35] : memref<1x128xf32, #tpu.memory_space<vmem>>, vector<1x128xf32>
    %88 = vector.broadcast %87 : vector<1x128xf32> to vector<16x128xf32>
    %89 = arith.addf %86, %88 : vector<16x128xf32>
    %90 = vector.extract_strided_slice %51 {offsets = [0, 0], sizes = [8, 1], strides = [1, 1]} : vector<8x2xf32> to vector<8x1xf32>
    %c0_36 = arith.constant 0 : index
    %c0_37 = arith.constant 0 : index
    %91 = vector.load %arg18[%c0_36, %c0_37] : memref<2x128xf32, #tpu.memory_space<vmem>>, vector<1x128xf32>
    %92 = vector.broadcast %90 : vector<8x1xf32> to vector<8x128xf32>
    %93 = vector.broadcast %91 : vector<1x128xf32> to vector<8x128xf32>
    %94 = arith.mulf %92, %93 : vector<8x128xf32>
    %95 = vector.extract_strided_slice %51 {offsets = [0, 1], sizes = [8, 1], strides = [1, 1]} : vector<8x2xf32> to vector<8x1xf32>
    %c1 = arith.constant 1 : index
    %c0_38 = arith.constant 0 : index
    %96 = vector.load %arg18[%c1, %c0_38] : memref<2x128xf32, #tpu.memory_space<vmem>>, vector<1x128xf32>
    %97 = vector.broadcast %95 : vector<8x1xf32> to vector<8x128xf32>
    %98 = vector.broadcast %96 : vector<1x128xf32> to vector<8x128xf32>
    %99 = arith.mulf %97, %98 : vector<8x128xf32>
    %100 = arith.addf %94, %99 : vector<8x128xf32>
    %101 = vector.extract_strided_slice %89 {offsets = [0, 0], sizes = [8, 128], strides = [1, 1]} : vector<16x128xf32> to vector<8x128xf32>
    %102 = arith.addf %101, %100 : vector<8x128xf32>
    %cst_39 = arith.constant 0.000000e+00 : f32
    %103 = vector.broadcast %cst_39 : f32 to vector<8x128xf32>
    %104 = arith.maximumf %102, %103 : vector<8x128xf32>
    %105 = vector.extract_strided_slice %89 {offsets = [8, 0], sizes = [8, 128], strides = [1, 1]} : vector<16x128xf32> to vector<8x128xf32>
    %106 = arith.addf %105, %100 : vector<8x128xf32>
    %cst_40 = arith.constant 0.000000e+00 : f32
    %107 = vector.broadcast %cst_40 : f32 to vector<8x128xf32>
    %108 = arith.maximumf %106, %107 : vector<8x128xf32>
    %109 = arith.addf %104, %108 : vector<8x128xf32>
    %c0_41 = arith.constant 0 : index
    %c0_42 = arith.constant 0 : index
    %110 = vector.load %arg20[%c0_41, %c0_42] : memref<128x16xf32, #tpu.memory_space<vmem>>, vector<128x16xf32>
    %111 = arith.truncf %109 : vector<8x128xf32> to vector<8x128xbf16>
    %112 = arith.truncf %110 : vector<128x16xf32> to vector<128x16xbf16>
    %cst_43 = arith.constant dense<0.000000e+00> : vector<8x16xf32>
    %113 = tpu.matmul %111, %112, %cst_43 {dimension_numbers = #tpu.dot_dimension_numbers<[1], [0], [0], [1], [0, 0, 1, 1], [], []>} : vector<8x128xbf16>, vector<128x16xbf16>, vector<8x16xf32> -> vector<8x16xf32>
    %c0_44 = arith.constant 0 : index
    %c0_45 = arith.constant 0 : index
    %114 = vector.load %arg21[%c0_44, %c0_45] : memref<1x16xf32, #tpu.memory_space<vmem>>, vector<1x16xf32>
    %cst_46 = arith.constant 2.000000e+00 : f32
    %115 = vector.broadcast %cst_46 : f32 to vector<1x16xf32>
    %116 = arith.mulf %115, %114 : vector<1x16xf32>
    %117 = vector.broadcast %116 : vector<1x16xf32> to vector<8x16xf32>
    %118 = arith.addf %113, %117 : vector<8x16xf32>
    %c0_47 = arith.constant 0 : index
    %c0_48 = arith.constant 0 : index
    %119 = vector.load %arg3[%c0_47, %c0_48] : memref<16x4xi32, #tpu.memory_space<vmem>>, vector<16x4xi32>
    %120 = tpu.iota {dimensions = array<i32: 1>} : vector<16x8xi32>
    %c0_49 = arith.constant 0 : index
    %c0_50 = arith.constant 0 : index
    %121 = vector.load %arg22[%c0_49, %c0_50] : memref<32x256xf32, #tpu.memory_space<vmem>>, vector<32x256xf32>
    %122 = vector.extract_strided_slice %121 {offsets = [0, 0], sizes = [8, 256], strides = [1, 1]} : vector<32x256xf32> to vector<8x256xf32>
    %cst_51 = arith.constant dense<0.000000e+00> : vector<8x256xf32>
    %123 = tpu.matmul %0, %122, %cst_51 {dimension_numbers = #tpu.dot_dimension_numbers<[1], [0], [0], [1], [0, 0, 1, 1], [], []>} : vector<8x8xf32>, vector<8x256xf32>, vector<8x256xf32> -> vector<8x256xf32>
    %124 = vector.extract_strided_slice %119 {offsets = [0, 0], sizes = [16, 1], strides = [1, 1]} : vector<16x4xi32> to vector<16x1xi32>
    %125 = vector.broadcast %124 : vector<16x1xi32> to vector<16x8xi32>
    %126 = arith.cmpi eq, %125, %120 : vector<16x8xi32>
    %127 = arith.extui %126 : vector<16x8xi1> to vector<16x8xi32>
    %128 = arith.sitofp %127 : vector<16x8xi32> to vector<16x8xf32>
    %129 = arith.truncf %128 : vector<16x8xf32> to vector<16x8xbf16>
    %130 = arith.truncf %123 : vector<8x256xf32> to vector<8x256xbf16>
    %cst_52 = arith.constant dense<0.000000e+00> : vector<16x256xf32>
    %131 = tpu.matmul %129, %130, %cst_52 {dimension_numbers = #tpu.dot_dimension_numbers<[1], [0], [0], [1], [0, 0, 1, 1], [], []>} : vector<16x8xbf16>, vector<8x256xbf16>, vector<16x256xf32> -> vector<16x256xf32>
    %132 = vector.extract_strided_slice %121 {offsets = [8, 0], sizes = [8, 256], strides = [1, 1]} : vector<32x256xf32> to vector<8x256xf32>
    %cst_53 = arith.constant dense<0.000000e+00> : vector<8x256xf32>
    %133 = tpu.matmul %0, %132, %cst_53 {dimension_numbers = #tpu.dot_dimension_numbers<[1], [0], [0], [1], [0, 0, 1, 1], [], []>} : vector<8x8xf32>, vector<8x256xf32>, vector<8x256xf32> -> vector<8x256xf32>
    %134 = vector.extract_strided_slice %119 {offsets = [0, 1], sizes = [16, 1], strides = [1, 1]} : vector<16x4xi32> to vector<16x1xi32>
    %135 = vector.broadcast %134 : vector<16x1xi32> to vector<16x8xi32>
    %136 = arith.cmpi eq, %135, %120 : vector<16x8xi32>
    %137 = arith.extui %136 : vector<16x8xi1> to vector<16x8xi32>
    %138 = arith.sitofp %137 : vector<16x8xi32> to vector<16x8xf32>
    %139 = arith.truncf %138 : vector<16x8xf32> to vector<16x8xbf16>
    %140 = arith.truncf %133 : vector<8x256xf32> to vector<8x256xbf16>
    %cst_54 = arith.constant dense<0.000000e+00> : vector<16x256xf32>
    %141 = tpu.matmul %139, %140, %cst_54 {dimension_numbers = #tpu.dot_dimension_numbers<[1], [0], [0], [1], [0, 0, 1, 1], [], []>} : vector<16x8xbf16>, vector<8x256xbf16>, vector<16x256xf32> -> vector<16x256xf32>
    %142 = arith.addf %131, %141 : vector<16x256xf32>
    %143 = vector.extract_strided_slice %121 {offsets = [16, 0], sizes = [8, 256], strides = [1, 1]} : vector<32x256xf32> to vector<8x256xf32>
    %cst_55 = arith.constant dense<0.000000e+00> : vector<8x256xf32>
    %144 = tpu.matmul %0, %143, %cst_55 {dimension_numbers = #tpu.dot_dimension_numbers<[1], [0], [0], [1], [0, 0, 1, 1], [], []>} : vector<8x8xf32>, vector<8x256xf32>, vector<8x256xf32> -> vector<8x256xf32>
    %145 = vector.extract_strided_slice %119 {offsets = [0, 2], sizes = [16, 1], strides = [1, 1]} : vector<16x4xi32> to vector<16x1xi32>
    %146 = vector.broadcast %145 : vector<16x1xi32> to vector<16x8xi32>
    %147 = arith.cmpi eq, %146, %120 : vector<16x8xi32>
    %148 = arith.extui %147 : vector<16x8xi1> to vector<16x8xi32>
    %149 = arith.sitofp %148 : vector<16x8xi32> to vector<16x8xf32>
    %150 = arith.truncf %149 : vector<16x8xf32> to vector<16x8xbf16>
    %151 = arith.truncf %144 : vector<8x256xf32> to vector<8x256xbf16>
    %cst_56 = arith.constant dense<0.000000e+00> : vector<16x256xf32>
    %152 = tpu.matmul %150, %151, %cst_56 {dimension_numbers = #tpu.dot_dimension_numbers<[1], [0], [0], [1], [0, 0, 1, 1], [], []>} : vector<16x8xbf16>, vector<8x256xbf16>, vector<16x256xf32> -> vector<16x256xf32>
    %153 = arith.addf %142, %152 : vector<16x256xf32>
    %154 = vector.extract_strided_slice %121 {offsets = [24, 0], sizes = [8, 256], strides = [1, 1]} : vector<32x256xf32> to vector<8x256xf32>
    %cst_57 = arith.constant dense<0.000000e+00> : vector<8x256xf32>
    %155 = tpu.matmul %0, %154, %cst_57 {dimension_numbers = #tpu.dot_dimension_numbers<[1], [0], [0], [1], [0, 0, 1, 1], [], []>} : vector<8x8xf32>, vector<8x256xf32>, vector<8x256xf32> -> vector<8x256xf32>
    %156 = vector.extract_strided_slice %119 {offsets = [0, 3], sizes = [16, 1], strides = [1, 1]} : vector<16x4xi32> to vector<16x1xi32>
    %157 = vector.broadcast %156 : vector<16x1xi32> to vector<16x8xi32>
    %158 = arith.cmpi eq, %157, %120 : vector<16x8xi32>
    %159 = arith.extui %158 : vector<16x8xi1> to vector<16x8xi32>
    %160 = arith.sitofp %159 : vector<16x8xi32> to vector<16x8xf32>
    %161 = arith.truncf %160 : vector<16x8xf32> to vector<16x8xbf16>
    %162 = arith.truncf %155 : vector<8x256xf32> to vector<8x256xbf16>
    %cst_58 = arith.constant dense<0.000000e+00> : vector<16x256xf32>
    %163 = tpu.matmul %161, %162, %cst_58 {dimension_numbers = #tpu.dot_dimension_numbers<[1], [0], [0], [1], [0, 0, 1, 1], [], []>} : vector<16x8xbf16>, vector<8x256xbf16>, vector<16x256xf32> -> vector<16x256xf32>
    %164 = arith.addf %153, %163 : vector<16x256xf32>
    %c0_59 = arith.constant 0 : index
    %c0_60 = arith.constant 0 : index
    %165 = vector.load %arg23[%c0_59, %c0_60] : memref<1x256xf32, #tpu.memory_space<vmem>>, vector<1x256xf32>
    %166 = vector.broadcast %165 : vector<1x256xf32> to vector<16x256xf32>
    %167 = arith.addf %164, %166 : vector<16x256xf32>
    %168 = vector.extract_strided_slice %167 {offsets = [0, 0], sizes = [8, 256], strides = [1, 1]} : vector<16x256xf32> to vector<8x256xf32>
    %cst_61 = arith.constant 0.000000e+00 : f32
    %169 = vector.broadcast %cst_61 : f32 to vector<8x256xf32>
    %170 = arith.maximumf %168, %169 : vector<8x256xf32>
    %171 = vector.extract_strided_slice %167 {offsets = [8, 0], sizes = [8, 256], strides = [1, 1]} : vector<16x256xf32> to vector<8x256xf32>
    %cst_62 = arith.constant 0.000000e+00 : f32
    %172 = vector.broadcast %cst_62 : f32 to vector<8x256xf32>
    %173 = arith.maximumf %171, %172 : vector<8x256xf32>
    %174 = arith.addf %170, %173 : vector<8x256xf32>
    %c0_63 = arith.constant 0 : index
    %c0_64 = arith.constant 0 : index
    %175 = vector.load %arg24[%c0_63, %c0_64] : memref<256x3xf32, #tpu.memory_space<vmem>>, vector<256x3xf32>
    %cst_65 = arith.constant dense<0.000000e+00> : vector<8x3xf32>
    %176 = tpu.matmul %174, %175, %cst_65 {dimension_numbers = #tpu.dot_dimension_numbers<[1], [0], [0], [1], [0, 0, 1, 1], [], []>} : vector<8x256xf32>, vector<256x3xf32>, vector<8x3xf32> -> vector<8x3xf32>
    %c0_66 = arith.constant 0 : index
    %c0_67 = arith.constant 0 : index
    %177 = vector.load %arg25[%c0_66, %c0_67] : memref<1x3xf32, #tpu.memory_space<vmem>>, vector<1x3xf32>
    %cst_68 = arith.constant 2.000000e+00 : f32
    %178 = vector.broadcast %cst_68 : f32 to vector<1x3xf32>
    %179 = arith.mulf %178, %177 : vector<1x3xf32>
    %180 = vector.broadcast %179 : vector<1x3xf32> to vector<8x3xf32>
    %181 = arith.addf %176, %180 : vector<8x3xf32>
    %182 = vector.extract_strided_slice %181 {offsets = [0, 0], sizes = [8, 1], strides = [1, 1]} : vector<8x3xf32> to vector<8x1xf32>
    %183 = vector.extract_strided_slice %181 {offsets = [0, 1], sizes = [8, 2], strides = [1, 1]} : vector<8x3xf32> to vector<8x2xf32>
    %184 = arith.mulf %183, %183 : vector<8x2xf32>
    %cst_69 = arith.constant dense<0.000000e+00> : vector<8xf32>
    %185 = vector.multi_reduction <add>, %184, %cst_69 [1] : vector<8x2xf32> to vector<8xf32>
    %186 = vector.shape_cast %185 : vector<8xf32> to vector<8x1xf32>
    %187 = math.sqrt %186 : vector<8x1xf32>
    %cst_70 = arith.constant 9.99999996E-13 : f32
    %188 = vector.broadcast %cst_70 : f32 to vector<8x1xf32>
    %189 = arith.maximumf %187, %188 : vector<8x1xf32>
    %190 = vector.broadcast %189 : vector<8x1xf32> to vector<8x2xf32>
    %191 = arith.divf %183, %190 : vector<8x2xf32>
    %192 = vector.extract_strided_slice %191 {offsets = [0, 0], sizes = [8, 1], strides = [1, 1]} : vector<8x2xf32> to vector<8x1xf32>
    %193 = vector.extract_strided_slice %191 {offsets = [0, 1], sizes = [8, 1], strides = [1, 1]} : vector<8x2xf32> to vector<8x1xf32>
    %194 = arith.negf %182 : vector<8x1xf32>
    %195 = math.exp %194 : vector<8x1xf32>
    %cst_71 = arith.constant 1.000000e+00 : f32
    %196 = vector.broadcast %cst_71 : f32 to vector<8x1xf32>
    %197 = arith.addf %196, %195 : vector<8x1xf32>
    %198 = arith.divf %196, %197 : vector<8x1xf32>
    %c0_72 = arith.constant 0 : index
    %c0_73 = arith.constant 0 : index
    %199 = vector.load %arg7[%c0_72, %c0_73] : memref<8x2xf32, #tpu.memory_space<vmem>>, vector<8x1xf32>
    %c0_74 = arith.constant 0 : index
    %c1_75 = arith.constant 1 : index
    %200 = vector.load %arg7[%c0_74, %c1_75] : memref<8x2xf32, #tpu.memory_space<vmem>>, vector<8x1xf32>
    %201 = tpu.iota {dimensions = array<i32: 1>} : vector<8x2xi32>
    %c0_i32 = arith.constant 0 : i32
    %202 = vector.broadcast %c0_i32 : i32 to vector<8x2xi32>
    %203 = arith.cmpi eq, %201, %202 : vector<8x2xi32>
    %204 = arith.mulf %199, %192 : vector<8x1xf32>
    %205 = arith.mulf %200, %193 : vector<8x1xf32>
    %206 = arith.subf %204, %205 : vector<8x1xf32>
    %207 = arith.mulf %200, %192 : vector<8x1xf32>
    %208 = arith.mulf %199, %193 : vector<8x1xf32>
    %209 = arith.addf %207, %208 : vector<8x1xf32>
    %210 = vector.shape_cast %206 : vector<8x1xf32> to vector<8x1xf32>
    %211 = vector.broadcast %210 : vector<8x1xf32> to vector<8x2xf32>
    %212 = vector.shape_cast %209 : vector<8x1xf32> to vector<8x1xf32>
    %213 = vector.broadcast %212 : vector<8x1xf32> to vector<8x2xf32>
    %214 = arith.select %203, %211, %213 : vector<8x2xi1>, vector<8x2xf32>
    %215 = vector.broadcast %198 : vector<8x1xf32> to vector<8x2xf32>
    %216 = arith.mulf %214, %215 : vector<8x2xf32>
    %c0_76 = arith.constant 0 : index
    %c0_77 = arith.constant 0 : index
    %217 = vector.load %arg10[%c0_76, %c0_77] : memref<1x8xi32, #tpu.memory_space<vmem>>, vector<1x8xi32>
    %218 = tpu.iota {dimensions = array<i32: 0>} : vector<4x8xi32>
    %219 = vector.broadcast %217 : vector<1x8xi32> to vector<4x8xi32>
    %220 = arith.cmpi eq, %219, %218 : vector<4x8xi32>
    %221 = arith.extui %220 : vector<4x8xi1> to vector<4x8xi32>
    %222 = arith.sitofp %221 : vector<4x8xi32> to vector<4x8xf32>
    %cst_78 = arith.constant dense<0.000000e+00> : vector<4x2xf32>
    %223 = tpu.matmul %222, %216, %cst_78 {dimension_numbers = #tpu.dot_dimension_numbers<[1], [0], [0], [1], [0, 0, 1, 1], [], []>} : vector<4x8xf32>, vector<8x2xf32>, vector<4x2xf32> -> vector<4x2xf32>
    %224 = arith.mulf %223, %223 : vector<4x2xf32>
    %cst_79 = arith.constant dense<0.000000e+00> : vector<4xf32>
    %225 = vector.multi_reduction <add>, %224, %cst_79 [1] : vector<4x2xf32> to vector<4xf32>
    %226 = vector.shape_cast %225 : vector<4xf32> to vector<4x1xf32>
    %227 = math.sqrt %226 : vector<4x1xf32>
    %c0_80 = arith.constant 0 : index
    %c0_81 = arith.constant 0 : index
    %228 = vector.load %arg4[%c0_80, %c0_81] : memref<8x2xi32, #tpu.memory_space<vmem>>, vector<8x2xi32>
    %229 = tpu.iota {dimensions = array<i32: 1>} : vector<8x8xi32>
    %c0_82 = arith.constant 0 : index
    %c0_83 = arith.constant 0 : index
    %230 = vector.load %arg26[%c0_82, %c0_83] : memref<16x128xf32, #tpu.memory_space<vmem>>, vector<16x128xf32>
    %231 = vector.extract_strided_slice %230 {offsets = [0, 0], sizes = [8, 128], strides = [1, 1]} : vector<16x128xf32> to vector<8x128xf32>
    %cst_84 = arith.constant dense<0.000000e+00> : vector<8x128xf32>
    %232 = tpu.matmul %0, %231, %cst_84 {dimension_numbers = #tpu.dot_dimension_numbers<[1], [0], [0], [1], [0, 0, 1, 1], [], []>} : vector<8x8xf32>, vector<8x128xf32>, vector<8x128xf32> -> vector<8x128xf32>
    %233 = vector.extract_strided_slice %228 {offsets = [0, 0], sizes = [8, 1], strides = [1, 1]} : vector<8x2xi32> to vector<8x1xi32>
    %234 = vector.broadcast %233 : vector<8x1xi32> to vector<8x8xi32>
    %235 = arith.cmpi eq, %234, %229 : vector<8x8xi32>
    %236 = arith.extui %235 : vector<8x8xi1> to vector<8x8xi32>
    %237 = arith.sitofp %236 : vector<8x8xi32> to vector<8x8xf32>
    %238 = arith.truncf %237 : vector<8x8xf32> to vector<8x8xbf16>
    %239 = arith.truncf %232 : vector<8x128xf32> to vector<8x128xbf16>
    %cst_85 = arith.constant dense<0.000000e+00> : vector<8x128xf32>
    %240 = tpu.matmul %238, %239, %cst_85 {dimension_numbers = #tpu.dot_dimension_numbers<[1], [0], [0], [1], [0, 0, 1, 1], [], []>} : vector<8x8xbf16>, vector<8x128xbf16>, vector<8x128xf32> -> vector<8x128xf32>
    %241 = vector.extract_strided_slice %230 {offsets = [8, 0], sizes = [8, 128], strides = [1, 1]} : vector<16x128xf32> to vector<8x128xf32>
    %cst_86 = arith.constant dense<0.000000e+00> : vector<8x128xf32>
    %242 = tpu.matmul %0, %241, %cst_86 {dimension_numbers = #tpu.dot_dimension_numbers<[1], [0], [0], [1], [0, 0, 1, 1], [], []>} : vector<8x8xf32>, vector<8x128xf32>, vector<8x128xf32> -> vector<8x128xf32>
    %243 = vector.extract_strided_slice %228 {offsets = [0, 1], sizes = [8, 1], strides = [1, 1]} : vector<8x2xi32> to vector<8x1xi32>
    %244 = vector.broadcast %243 : vector<8x1xi32> to vector<8x8xi32>
    %245 = arith.cmpi eq, %244, %229 : vector<8x8xi32>
    %246 = arith.extui %245 : vector<8x8xi1> to vector<8x8xi32>
    %247 = arith.sitofp %246 : vector<8x8xi32> to vector<8x8xf32>
    %248 = arith.truncf %247 : vector<8x8xf32> to vector<8x8xbf16>
    %249 = arith.truncf %242 : vector<8x128xf32> to vector<8x128xbf16>
    %cst_87 = arith.constant dense<0.000000e+00> : vector<8x128xf32>
    %250 = tpu.matmul %248, %249, %cst_87 {dimension_numbers = #tpu.dot_dimension_numbers<[1], [0], [0], [1], [0, 0, 1, 1], [], []>} : vector<8x8xbf16>, vector<8x128xbf16>, vector<8x128xf32> -> vector<8x128xf32>
    %251 = arith.addf %240, %250 : vector<8x128xf32>
    %c0_88 = arith.constant 0 : index
    %c0_89 = arith.constant 0 : index
    %252 = vector.load %arg28[%c0_88, %c0_89] : memref<1x128xf32, #tpu.memory_space<vmem>>, vector<1x128xf32>
    %253 = vector.broadcast %252 : vector<1x128xf32> to vector<8x128xf32>
    %254 = arith.addf %251, %253 : vector<8x128xf32>
    %c0_90 = arith.constant 0 : index
    %c0_91 = arith.constant 0 : index
    %255 = vector.load %arg27[%c0_90, %c0_91] : memref<1x128xf32, #tpu.memory_space<vmem>>, vector<1x128xf32>
    %256 = vector.broadcast %227 : vector<4x1xf32> to vector<4x128xf32>
    %257 = vector.broadcast %255 : vector<1x128xf32> to vector<4x128xf32>
    %258 = arith.mulf %256, %257 : vector<4x128xf32>
    %259 = vector.extract_strided_slice %254 {offsets = [0, 0], sizes = [4, 128], strides = [1, 1]} : vector<8x128xf32> to vector<4x128xf32>
    %260 = arith.addf %259, %258 : vector<4x128xf32>
    %cst_92 = arith.constant 0.000000e+00 : f32
    %261 = vector.broadcast %cst_92 : f32 to vector<4x128xf32>
    %262 = arith.maximumf %260, %261 : vector<4x128xf32>
    %263 = vector.extract_strided_slice %254 {offsets = [4, 0], sizes = [4, 128], strides = [1, 1]} : vector<8x128xf32> to vector<4x128xf32>
    %264 = arith.addf %263, %258 : vector<4x128xf32>
    %cst_93 = arith.constant 0.000000e+00 : f32
    %265 = vector.broadcast %cst_93 : f32 to vector<4x128xf32>
    %266 = arith.maximumf %264, %265 : vector<4x128xf32>
    %267 = arith.addf %262, %266 : vector<4x128xf32>
    %c0_94 = arith.constant 0 : index
    %c0_95 = arith.constant 0 : index
    %268 = vector.load %arg29[%c0_94, %c0_95] : memref<128x16xf32, #tpu.memory_space<vmem>>, vector<128x16xf32>
    %269 = arith.truncf %267 : vector<4x128xf32> to vector<4x128xbf16>
    %270 = arith.truncf %268 : vector<128x16xf32> to vector<128x16xbf16>
    %cst_96 = arith.constant dense<0.000000e+00> : vector<4x16xf32>
    %271 = tpu.matmul %269, %270, %cst_96 {dimension_numbers = #tpu.dot_dimension_numbers<[1], [0], [0], [1], [0, 0, 1, 1], [], []>} : vector<4x128xbf16>, vector<128x16xbf16>, vector<4x16xf32> -> vector<4x16xf32>
    %c0_97 = arith.constant 0 : index
    %c0_98 = arith.constant 0 : index
    %272 = vector.load %arg30[%c0_97, %c0_98] : memref<1x16xf32, #tpu.memory_space<vmem>>, vector<1x16xf32>
    %cst_99 = arith.constant 2.000000e+00 : f32
    %273 = vector.broadcast %cst_99 : f32 to vector<1x16xf32>
    %274 = arith.mulf %273, %272 : vector<1x16xf32>
    %275 = vector.broadcast %274 : vector<1x16xf32> to vector<4x16xf32>
    %276 = arith.addf %271, %275 : vector<4x16xf32>
    %c0_100 = arith.constant 0 : index
    %c0_101 = arith.constant 0 : index
    %277 = vector.load %arg8[%c0_100, %c0_101] : memref<1x8xi32, #tpu.memory_space<vmem>>, vector<1x8xi32>
    %278 = tpu.iota {dimensions = array<i32: 0>} : vector<2x8xi32>
    %279 = vector.broadcast %277 : vector<1x8xi32> to vector<2x8xi32>
    %280 = arith.cmpi eq, %279, %278 : vector<2x8xi32>
    %281 = arith.extui %280 : vector<2x8xi1> to vector<2x8xi32>
    %282 = arith.sitofp %281 : vector<2x8xi32> to vector<2x8xf32>
    %cst_102 = arith.constant dense<0.000000e+00> : vector<2x16xf32>
    %283 = tpu.matmul %282, %50, %cst_102 {dimension_numbers = #tpu.dot_dimension_numbers<[1], [0], [0], [1], [0, 0, 1, 1], [], []>} : vector<2x8xf32>, vector<8x16xf32>, vector<2x16xf32> -> vector<2x16xf32>
    %c0_103 = arith.constant 0 : index
    %c0_104 = arith.constant 0 : index
    %284 = vector.load %arg31[%c0_103, %c0_104] : memref<2x48xf32, #tpu.memory_space<vmem>>, vector<2x16xf32>
    tpu.vector_store %arg31[%c0_103, %c0_104], %283 {strides = array<i32>} : memref<2x48xf32, #tpu.memory_space<vmem>>, vector<2x16xf32>,
    %c0_105 = arith.constant 0 : index
    %c0_106 = arith.constant 0 : index
    %285 = vector.load %arg9[%c0_105, %c0_106] : memref<1x8xi32, #tpu.memory_space<vmem>>, vector<1x8xi32>
    %286 = tpu.iota {dimensions = array<i32: 0>} : vector<2x8xi32>
    %287 = vector.broadcast %285 : vector<1x8xi32> to vector<2x8xi32>
    %288 = arith.cmpi eq, %287, %286 : vector<2x8xi32>
    %289 = arith.extui %288 : vector<2x8xi1> to vector<2x8xi32>
    %290 = arith.sitofp %289 : vector<2x8xi32> to vector<2x8xf32>
    %cst_107 = arith.constant dense<0.000000e+00> : vector<2x16xf32>
    %291 = tpu.matmul %290, %118, %cst_107 {dimension_numbers = #tpu.dot_dimension_numbers<[1], [0], [0], [1], [0, 0, 1, 1], [], []>} : vector<2x8xf32>, vector<8x16xf32>, vector<2x16xf32> -> vector<2x16xf32>
    %c0_108 = arith.constant 0 : index
    %c16 = arith.constant 16 : index
    %292 = vector.load %arg31[%c0_108, %c16] : memref<2x48xf32, #tpu.memory_space<vmem>>, vector<2x16xf32>
    tpu.vector_store %arg31[%c0_108, %c16], %291 {strides = array<i32>} : memref<2x48xf32, #tpu.memory_space<vmem>>, vector<2x16xf32>,
    %c0_109 = arith.constant 0 : index
    %c0_110 = arith.constant 0 : index
    %293 = vector.load %arg11[%c0_109, %c0_110] : memref<1x4xi32, #tpu.memory_space<vmem>>, vector<1x4xi32>
    %294 = tpu.iota {dimensions = array<i32: 0>} : vector<2x4xi32>
    %295 = vector.broadcast %293 : vector<1x4xi32> to vector<2x4xi32>
    %296 = arith.cmpi eq, %295, %294 : vector<2x4xi32>
    %297 = arith.extui %296 : vector<2x4xi1> to vector<2x4xi32>
    %298 = arith.sitofp %297 : vector<2x4xi32> to vector<2x4xf32>
    %cst_111 = arith.constant dense<0.000000e+00> : vector<2x16xf32>
    %299 = tpu.matmul %298, %276, %cst_111 {dimension_numbers = #tpu.dot_dimension_numbers<[1], [0], [0], [1], [0, 0, 1, 1], [], []>} : vector<2x4xf32>, vector<4x16xf32>, vector<2x16xf32> -> vector<2x16xf32>
    %c0_112 = arith.constant 0 : index
    %c32 = arith.constant 32 : index
    %300 = vector.load %arg31[%c0_112, %c32] : memref<2x48xf32, #tpu.memory_space<vmem>>, vector<2x16xf32>
    tpu.vector_store %arg31[%c0_112, %c32], %299 {strides = array<i32>} : memref<2x48xf32, #tpu.memory_space<vmem>>, vector<2x16xf32>,
    %c0_113 = arith.constant 0 : index
    %c0_114 = arith.constant 0 : index
    %301 = vector.load %arg32[%c0_113, %c0_114] : memref<8x4xf32, #tpu.memory_space<vmem>>, vector<8x1xf32>
    tpu.vector_store %arg32[%c0_113, %c0_114], %187 {strides = array<i32>} : memref<8x4xf32, #tpu.memory_space<vmem>>, vector<8x1xf32>,
    %c0_115 = arith.constant 0 : index
    %c1_116 = arith.constant 1 : index
    %302 = vector.load %arg32[%c0_115, %c1_116] : memref<8x4xf32, #tpu.memory_space<vmem>>, vector<8x1xf32>
    tpu.vector_store %arg32[%c0_115, %c1_116], %182 {strides = array<i32>} : memref<8x4xf32, #tpu.memory_space<vmem>>, vector<8x1xf32>,
    %c0_117 = arith.constant 0 : index
    %c2 = arith.constant 2 : index
    %303 = vector.load %arg32[%c0_117, %c2] : memref<8x4xf32, #tpu.memory_space<vmem>>, vector<8x1xf32>
    tpu.vector_store %arg32[%c0_117, %c2], %192 {strides = array<i32>} : memref<8x4xf32, #tpu.memory_space<vmem>>, vector<8x1xf32>,
    %c0_118 = arith.constant 0 : index
    %c3 = arith.constant 3 : index
    %304 = vector.load %arg32[%c0_118, %c3] : memref<8x4xf32, #tpu.memory_space<vmem>>, vector<8x1xf32>
    tpu.vector_store %arg32[%c0_118, %c3], %193 {strides = array<i32>} : memref<8x4xf32, #tpu.memory_space<vmem>>, vector<8x1xf32>,
    %c0_119 = arith.constant 0 : index
    %c0_120 = arith.constant 0 : index
    %305 = vector.load %arg33[%c0_119, %c0_120] : memref<4x16xf32, #tpu.memory_space<vmem>>, vector<4x16xf32>
    tpu.vector_store %arg33[%c0_119, %c0_120], %276 {strides = array<i32>} : memref<4x16xf32, #tpu.memory_space<vmem>>, vector<4x16xf32>,
    %c0_121 = arith.constant 0 : index
    %c0_122 = arith.constant 0 : index
    %306 = vector.load %arg34[%c0_121, %c0_122] : memref<4x2xf32, #tpu.memory_space<vmem>>, vector<4x2xf32>
    tpu.vector_store %arg34[%c0_121, %c0_122], %223 {strides = array<i32>} : memref<4x2xf32, #tpu.memory_space<vmem>>, vector<4x2xf32>,
    return
  }
}

</mosaic_0001>

<bundles_post_ra>
// kernel: internal_coordinate_encoder_forward.1
= control target key start
LH: loop header
LB: loop body
LE: loop exit
PB: predicated region body
PF: predicated region fallthrough
CT: control target
= control target key end

     0   :  { %s3029_s6 = smov 1   ;;  %s3030_s10 = smov 2   ;;  %s3704_s0 = inlined_call_operand.smem [shape: u32[35], index: -1, kind: input, shape index: {}] }
   0x1   :  { %s3084_s5 = sld [smem:[%s3704_s0]]   ;;  %s3031_s14 = smov 3  }
   0x2   :  { %s3089_s9 = sld [smem:[%s3704_s0 + %s3029_s6]]   ;;  %s3032_s18 = smov 4  }
   0x3   :  { %s3094_s13 = sld [smem:[%s3704_s0 + %s3030_s10]]   ;;  %s3033_s22 = smov 5  }
   0x4   :  { %s3099_s17 = sld [smem:[%s3704_s0 + %s3031_s14]]   ;;  %s3034_s26 = smov 6  }
   0x5   :  { %s3104_s21 = sld [smem:[%s3704_s0 + %s3032_s18]]   ;;  %s3035_s30 = smov 7  }
   0x6   :  { %s3109_s25 = sld [smem:[%s3704_s0 + %s3033_s22]]   ;;  %s3036_s4 = smov 8  }
   0x7   :  { %s3114_s29 = sld [smem:[%s3704_s0 + %s3034_s26]]   ;;  %s3037_s10 = smov 9  }
   0x8   :  { %s3119_s3 = sld [smem:[%s3704_s0 + %s3035_s30]]   ;;  %s3038_s15 = smov 10  }
   0x9   :  { %s3124_s8 = sld [smem:[%s3704_s0 + %s3036_s4]]   ;;  %s3039_s20 = smov 11  }
   0xa   :  { %s3129_s14 = sld [smem:[%s3704_s0 + %s3037_s10]]   ;;  %s3040_s26 = smov 12  }
   0xb   :  { %3708 = sst [smem:[#allocation8_spill]] %s3104_s21  ;;  %s3041_s1 = smov 13  }
   0xc   :  { %s3134_s19 = sld [smem:[%s3704_s0 + %s3038_s15]]   ;;  %s3042_s7 = smov 14  }
   0xd   :  { %s3139_s24 = sld [smem:[%s3704_s0 + %s3039_s20]]   ;;  %s3043_s15 = smov 15  }
   0xe   :  { %3709 = sst [smem:[#allocation9_spill]] %s3119_s3  ;;  %s3044_s22 = smov 16  }
   0xf   :  { %3710 = sst [smem:[#allocation10_spill]] %s3124_s8  ;;  %s3045_s28 = smov 17  }
  0x10   :  { %3711 = sst [smem:[#allocation11_spill]] %s3129_s14 }
  0x11   :  { %s3144_s30 = sld [smem:[%s3704_s0 + %s3040_s26]]  }
  0x12   :  { %3712 = sst [smem:[#allocation12_spill]] %s3134_s19 }
  0x13   :  { %3713 = sst [smem:[#allocation13_spill]] %s3139_s24 }
  0x14   :  { %s3149_s6 = sld [smem:[%s3704_s0 + %s3041_s1]]  }
  0x15   :  { %s3154_s12 = sld [smem:[%s3704_s0 + %s3042_s7]]   ;;  %s3046_s7 = smov 18  }
  0x16   :  { %s3159_s20 = sld [smem:[%s3704_s0 + %s3043_s15]]   ;;  %s3047_s15 = smov 19  }
  0x17   :  { %s3164_s27 = sld [smem:[%s3704_s0 + %s3044_s22]]   ;;  %s3048_s22 = smov 20  }
  0x18   :  { %s3169_s4 = sld [smem:[%s3704_s0 + %s3045_s28]]   ;;  %s3049_s28 = smov 21  }
  0x19   :  { %s3174_s24 = sld [smem:[%s3704_s0 + %s3046_s7]]   ;;  %s3050_s7 = smov 22  }
  0x1a   :  { %s3179_s14 = sld [smem:[%s3704_s0 + %s3047_s15]]   ;;  %s3051_s15 = smov 23  }
  0x1b   :  { %s3184_s8 = sld [smem:[%s3704_s0 + %s3048_s22]]   ;;  %s3052_s22 = smov 24  }
  0x1c   :  { %s3194_s19 = sld [smem:[%s3704_s0 + %s3050_s7]]   ;;  %s3054_s7 = smov 26  }
  0x1d   :  { %3714 = sst [smem:[#allocation14_spill]] %s3164_s27 }
  0x1e   :  { %s3189_s27 = sld [smem:[%s3704_s0 + %s3049_s28]]   ;;  %s3053_s28 = smov 25  }
  0x1f   :  { %s3199_s3 = sld [smem:[%s3704_s0 + %s3051_s15]]   ;;  %s3055_s15 = smov 27  }
  0x20   :  { %3715 = sst [smem:[#allocation15_spill]] %s3179_s14 }
  0x21   :  { %s3204_s21 = sld [smem:[%s3704_s0 + %s3052_s22]]   ;;  %s3056_s22 = smov 28  }
  0x22   :  { %s3214_s14 = sld [smem:[%s3704_s0 + %s3054_s7]]   ;;  %s3058_s7 = smov 30  }
  0x24   :  { %3716 = sst [smem:[#allocation16_spill]] %s3189_s27 }
  0x25   :  { %3717 = sst [smem:[#allocation17_spill]] %s3199_s3 }
  0x26   :  { %s3209_s27 = sld [smem:[%s3704_s0 + %s3053_s28]]   ;;  %s3057_s28 = smov 29  }
  0x27   :  { %3718 = sst [smem:[#allocation18_spill]] %s3204_s21 }
  0x28   :  { %3720 = sst [smem:[#allocation20_spill]] %s3214_s14 }
  0x29   :  { %s3219_s3 = sld [smem:[%s3704_s0 + %s3055_s15]]   ;;  %s3059_s15 = smov 31  }
  0x2a   :  { %s3224_s21 = sld [smem:[%s3704_s0 + %s3056_s22]]   ;;  %s3060_s22 = smov 32  }
  0x2b   :  { %s3234_s14 = sld [smem:[%s3704_s0 + %s3058_s7]]   ;;  %s3062_s7 = smov 34  }
  0x2c   :  { %3719 = sst [smem:[#allocation19_spill]] %s3209_s27 }
  0x2d   :  { %s3229_s27 = sld [smem:[%s3704_s0 + %s3057_s28]]   ;;  %s3061_s28 = smov 33  }
  0x2f   :  { %3721 = sst [smem:[#allocation21_spill]] %s3219_s3 }
  0x30   :  { %3722 = sst [smem:[#allocation22_spill]] %s3224_s21 }
  0x31   :  { %3724 = sst [smem:[#allocation24_spill]] %s3234_s14 }
  0x32   :  { %s3239_s3 = sld [smem:[%s3704_s0 + %s3059_s15]]  }
  0x33   :  { %3723 = sst [smem:[#allocation23_spill]] %s3229_s27 }
  0x34   :  { %s3244_s21 = sld [smem:[%s3704_s0 + %s3060_s22]]  }
  0x35   :  { %s3249_s27 = sld [smem:[%s3704_s0 + %s3061_s28]]  }
  0x36   :  { %s3254_s14 = sld [smem:[%s3704_s0 + %s3062_s7]]  }
  0x37   :  { %75 = vsyncpa [#allocation3], 0  ;;  %v145_v0 = vld [vmem:[%s3144_s30] sm:$0xff]  ;;  %v146_v1 = vld [vmem:[%s3144_s30 + $0x8] sm:$0xff]  ;;  %v3063_v2 = vmov 0.0   ;;  %vm147_vm0 = vcmask 64512  }
  0x38   :  { %2751 = vmatprep.subr.mxu0 %v3063_v2  ;;  %2756 = vmatprep.subr.mxu1 %v3063_v2  ;;  %v3261_v3 = vld [vmem:[%s3084_s5] sm:$0xff]  ;;  %vm3064_vm1 = vmmov 0  }
  0x39   :  { %2752 = vmatpush3.msra.mxu0 %v145_v0  ;;  %2753 = vmatprep.mubr.msk.f32.mxu0 %vm3064_vm1, %v3063_v2  ;;  %v516_v4 = vld [vmem:[%s3094_s13] sm:$0xff] }
  0x3a   :  { %2757 = vmatpush3.msra.mxu1 %v146_v1  ;;  %2758 = vmatprep.mubr.msk.f32.mxu1 %vm3064_vm1, %v3063_v2  ;;  %v141_v5 = vld [vmem:[%s3089_s9] sm:$0xff] }
  0x3b   :  { %76 = vsyncpa [#allocation5], 0  ;;  %2754 = vmatmul.mubr.msk.f32.vlgmr.msra.gmra.mxu0 %vm147_vm0, %v3261_v3  ;;  %2759 = vmatmul.mubr.msk.f32.vlgmr.msra.gmra.mxu1 %vm147_vm0, %v3261_v3  ;;  %v3065_v6 = vmov 1   ;;  %v3066_v7 = vmov 0   ;;  %v517_v8 = vld [vmem:[%s3094_s13 + $0x8] sm:$0xff]  ;;  %v3067_v10 = vmov 2   ;;  %v143_v14 = vlaneseq }
  0x3c   :  { %2956 = vset.pattern.permute.xlu1 %v3065_v6  ;;  %2955 = vset.pattern.permute.xlu0 %v3066_v7  ;;  %v142_v9 = vld [vmem:[%s3089_s9 + $0x8] sm:$0xff]  ;;  %v3288_v12 = vld [vmem:[%s3099_s17] sm:$0xff]  ;;  %v456_v59 = vld [vmem:[%s3159_s20 + $0x70] sm:$0xff]  ;;  %s3725_s0 = sld [smem:[#allocation15_spill]]  ;;  %s3072_s23 = smov 16  }
  0x3d   :  { %676 = vperm.xlu1 %2956, %v516_v4   ;;  %222 = vperm.xlu0 %2955, %v141_v5   ;;  %v3285_v11 = vld [vmem:[%s3099_s17 + $0x8] sm:$0xff]  ;;  %v423_v13 = vld [vmem:[%s3109_s25] sm:$0xff]  ;;  %v3304_v15 = vand.u32 127, %v143_v14  ;;  %v457_v60 = vld [vmem:[%s3159_s20 + $0x78] sm:$0xff]  ;;  %s3726_s9 = sld [smem:[#allocation18_spill]]  ;;  %s3073_s26 = smov [#allocation4]  }
  0x3e   :  { %2761 = vmatprep.subr.bf16.mxu0 %v3063_v2  ;;  %2767 = vmatprep.subr.bf16.mxu1 %v3063_v2  ;;  %s3727_s13 = sld [smem:[#allocation17_spill]]  ;;  %s2534_s28 = sshll.u32 %s3073_s26, 4  ;;  %s2535_s28 = int_to_ptr.vmem [resolvable:$true] %s2534_s28 }
  0x3f   :  { %2763 = vmatprep.mubr.msk.bf16.mxu0 %vm3064_vm1, %v3063_v2  ;;  %2769 = vmatprep.mubr.msk.bf16.mxu1 %vm3064_vm1, %v3063_v2  ;;  %s3728_s17 = sld [smem:[#allocation19_spill]]  ;;  %s2985_s1 = scalar_lea.vmem %s2535_s28, 64 }
  0x40   :  { %s3729_s25 = sld [smem:[#allocation8_spill]]  ;;  %p2986_p0 = scmp.ne.s32.totalorder %s2535_s28, %s2985_s1 }
  0x41   :  { %679 = vperm.xlu1 %2956, %v517_v8   ;;  %225 = vperm.xlu0 %2955, %v142_v9   ;;  %s3731_s30 = sld [smem:[#allocation12_spill]]  ;;  %p2990_p1 = scmp.lt.s32.totalorder %s2535_s28, %s2535_s28 }
  0x42   :  { %s3738_s15 = sld [smem:[#allocation22_spill]]  ;;  %p2991_p2 = scmp.lt.s32.totalorder %s2985_s1, %s2985_s1 }
  0x43   :  { %s3739_s16 = sld [smem:[#allocation11_spill]] }
  0x44   :  { %s3740_s18 = sld [smem:[#allocation24_spill]]  ;;  %p2992_p3 = por %p2991_p2, %p2990_p1 }
  0x45   :  { %2957 = vset.pattern.permute.xlu1 %v3066_v7  ;;  %592 = vperm.xlu0 %2955, %v516_v4   ;;  %s3741_s22 = sld [smem:[#allocation13_spill]] }
  0x46   :  { %595 = vperm.xlu1 %2957, %v517_v8   ;;  %p2993_p4 = pnand %p2992_p3, %p2986_p0 }
  0x49   :  { %2958 = vset.pattern.permute.xlu0 %v3067_v10 }
  0x4a   :  { %2959 = vset.pattern.permute.xlu1 %v3067_v10  ;;  %854 = vperm.xlu0 %2958, %v516_v4   ;;  %v518_v4 = vld [vmem:[%s3169_s4] sm:$0xff] }
  0x4b   :  { %857 = vperm.xlu1 %2959, %v517_v8   ;;  %v454_v8 = vld [vmem:[%s3159_s20 + $0x60] sm:$0xff] }
  0x4e   :  { %2961 = vset.pattern.permute.xlu0 %v3065_v6 }
  0x4f   :  { %2960 = vset.pattern.permute.xlu1 %v3065_v6  ;;  %1196 = vperm.xlu0 %2961, %v3285_v11  }
  0x50   :  { %1193 = vperm.xlu1 %2960, %v3288_v12  }
  0x53   :  { %2963 = vset.pattern.permute.xlu0 %v3067_v10 }
  0x54   :  { %2962 = vset.pattern.permute.xlu1 %v3066_v7  ;;  %1383 = vperm.xlu0 %2963, %v3288_v12  }
  0x55   :  { %1107 = vperm.xlu1 %2962, %v3288_v12  }
  0x58   :  { %2966 = vset.pattern.permute.xlu0 %v3065_v6 }
  0x59   :  { %1110 = vperm.xlu1 %2962, %v3285_v11   ;;  %309 = vperm.xlu0 %2966, %v142_v9   ;;  %v455_v9 = vld [vmem:[%s3159_s20 + $0x68] sm:$0xff] }
  0x5d   :  { %2964 = vset.pattern.permute.xlu1 %v3067_v10  ;;  %2968 = vset.pattern.permute.xlu0 %v3066_v7  ;;  %v465_v10 = vpack.c.bf16 %v455_v9, %v454_v8 }
  0x5e   :  { %1386 = vperm.xlu1 %2964, %v3285_v11   ;;  %427 = vperm.xlu0 %2968, %v423_v13   ;;  %v452_v13 = vld [vmem:[%s3159_s20 + $0x50] sm:$0xff] }
  0x62   :  { %2965 = vset.pattern.permute.xlu1 %v3065_v6 }
  0x63   :  { %306 = vperm.xlu1 %2965, %v141_v5   ;;  %v466_v5 = vpack.c.bf16 %v457_v60, %v456_v59 }
  0xb8   :  { %v677_v16 = vpop.permute.xlu1 %676  ;;  %v223_v17 = vpop.permute.xlu0 %222 }
  0xb9   :  { %vm681_vm2 = vcmp.eq.s32.totalorder %v677_v16, %v3304_v15  ;;  %v453_v16 = vld [vmem:[%s3159_s20 + $0x58] sm:$0xff] }
  0xba   :  { %v3308_v18 = vsel %vm681_vm2, 1.0, %v3063_v2  ;;  %vm227_vm2 = vcmp.eq.s32.totalorder %v223_v17, %v3304_v15  ;;  %v519_v17 = vld [vmem:[%s3169_s4 + $0x8] sm:$0xff] }
  0xbb   :  { %v2587_v56 = vsel %vm227_vm2, 1.0, %v3063_v2 }
  0xbc   :  { %v680_v19 = vpop.permute.xlu1 %679  ;;  %v226_v20 = vpop.permute.xlu0 %225 }
  0xbd   :  { %vm682_vm3 = vcmp.eq.s32.totalorder %v680_v19, %v3304_v15  ;;  %v464_v19 = vpack.c.bf16 %v453_v16, %v452_v13 }
  0xbe   :  { %v3312_v21 = vsel %vm682_vm3, 1.0, %v3063_v2  ;;  %vm228_vm3 = vcmp.eq.s32.totalorder %v226_v20, %v3304_v15  ;;  %v450_v20 = vld [vmem:[%s3159_s20 + $0x40] sm:$0xff] }
  0xbf   :  { %v687_v22 = vpack.c.bf16 %v3312_v21, %v3308_v18  ;;  %v2588_v57 = vsel %vm228_vm3, 1.0, %v3063_v2  ;;  %v966_v18 = vld [vmem:[%s3184_s8 + $0x70] sm:$0xff]  ;;  %v967_v21 = vld [vmem:[%s3184_s8 + $0x78] sm:$0xff] }
  0xc0   :  { %v593_v23 = vpop.permute.xlu0 %592  ;;  %v233_v1 = vpack.c.bf16 %v2588_v57, %v2587_v56  ;;  %v2595_v56 = vld [vmem:[%s3149_s6] ss:$0 sm:$0xff]  ;;  %s3732_s6 = sld [smem:[#allocation20_spill]] }
  0xc1   :  { %v596_v24 = vpop.permute.xlu1 %595  ;;  %vm597_vm4 = vcmp.eq.s32.totalorder %v593_v23, %v3304_v15  ;;  %v451_v23 = vld [vmem:[%s3159_s20 + $0x48] sm:$0xff] }
  0xc2   :  { %vm598_vm5 = vcmp.eq.s32.totalorder %v596_v24, %v3304_v15  ;;  %v3319_v25 = vsel %vm597_vm4, 1.0, %v3063_v2  ;;  %vm322_vm4 = vcmask 1043456   ;;  %v463_v24 = vpack.c.bf16 %v451_v23, %v450_v20 }
  0xc3   :  { %v3322_v26 = vsel %vm598_vm5, 1.0, %v3063_v2 }
  0xc4   :  { %v603_v27 = vpack.c.bf16 %v3322_v26, %v3319_v25  ;;  %v976_v25 = vpack.c.bf16 %v967_v21, %v966_v18  ;;  %v964_v26 = vld [vmem:[%s3184_s8 + $0x60] sm:$0xff] }
  0xc5   :  { %v855_v28 = vpop.permute.xlu0 %854  ;;  %v952_v21 = vld [vmem:[%s3184_s8] sm:$0xff] }
  0xc6   :  { %v858_v29 = vpop.permute.xlu1 %857  ;;  %vm859_vm6 = vcmp.eq.s32.totalorder %v855_v28, %v3304_v15  ;;  %v448_v28 = vld [vmem:[%s3159_s20 + $0x30] sm:$0xff] }
  0xc7   :  { %vm860_vm7 = vcmp.eq.s32.totalorder %v858_v29, %v3304_v15  ;;  %v3329_v30 = vsel %vm859_vm6, 1.0, %v3063_v2  ;;  %v449_v29 = vld [vmem:[%s3159_s20 + $0x38] sm:$0xff] }
  0xc8   :  { %v3332_v31 = vsel %vm860_vm7, 1.0, %v3063_v2  ;;  %vm1732_vm7 = vcmask 15360  }
  0xc9   :  { %v865_v32 = vpack.c.bf16 %v3332_v31, %v3329_v30 }
  0xca   :  { %v1197_v33 = vpop.permute.xlu0 %1196 }
  0xcb   :  { %v1194_v34 = vpop.permute.xlu1 %1193  ;;  %vm1199_vm8 = vcmp.eq.s32.totalorder %v1197_v33, %v3304_v15  ;;  %v462_v33 = vpack.c.bf16 %v449_v29, %v448_v28 }
  0xcc   :  { %vm1198_vm9 = vcmp.eq.s32.totalorder %v1194_v34, %v3304_v15  ;;  %v3339_v35 = vsel %vm1199_vm8, 1.0, %v3063_v2  ;;  %v446_v34 = vld [vmem:[%s3159_s20 + $0x20] sm:$0xff] }
  0xcd   :  { %v3342_v36 = vsel %vm1198_vm9, 1.0, %v3063_v2  ;;  %vm2498_vm9 = vcmask 7168  }
  0xce   :  { %v1204_v37 = vpack.c.bf16 %v3339_v35, %v3342_v36 }
  0xcf   :  { %v1384_v41 = vpop.permute.xlu0 %1383 }
  0xd0   :  { %v1108_v38 = vpop.permute.xlu1 %1107  ;;  %vm1388_vm12 = vcmp.eq.s32.totalorder %v1384_v41, %v3304_v15  ;;  %v444_v41 = vld [vmem:[%s3159_s20 + $0x10] sm:$0xff] }
  0xd1   :  { %vm1112_vm10 = vcmp.eq.s32.totalorder %v1108_v38, %v3304_v15  ;;  %v3358_v45 = vsel %vm1388_vm12, 1.0, %v3063_v2  ;;  %v447_v38 = vld [vmem:[%s3159_s20 + $0x28] sm:$0xff]  ;;  %vm1753_vm12 = vcmp.eq.s32.totalorder %v3304_v15, 0 }
  0xd2   :  { %v3348_v39 = vsel %vm1112_vm10, 1.0, %v3063_v2 }
  0xd4   :  { %v1111_v40 = vpop.permute.xlu1 %1110  ;;  %v310_v49 = vpop.permute.xlu0 %309 }
  0xd5   :  { %vm1113_vm11 = vcmp.eq.s32.totalorder %v1111_v40, %v3304_v15  ;;  %vm312_vm15 = vcmp.eq.s32.totalorder %v310_v49, %v3304_v15  ;;  %v461_v40 = vpack.c.bf16 %v447_v38, %v446_v34  ;;  %v442_v49 = vld [vmem:[%s3159_s20] sm:$0xff]  ;;  %v520_v38 = vld [vmem:[%s3169_s4 + $0x10] sm:$0xff]  ;;  %s3737_s4 = sld [smem:[#allocation21_spill]] }
  0xd6   :  { %v3352_v42 = vsel %vm1113_vm11, 1.0, %v3063_v2  ;;  %v2591_v53 = vsel %vm312_vm15, 1.0, %v3063_v2  ;;  %vm2504_vm11 = vcmask 15368  }
  0xd7   :  { %v1118_v43 = vpack.c.bf16 %v3352_v42, %v3348_v39 }
  0xd9   :  { %v1387_v44 = vpop.permute.xlu1 %1386 }
  0xda   :  { %vm1389_vm13 = vcmp.eq.s32.totalorder %v1387_v44, %v3304_v15  ;;  %v445_v44 = vld [vmem:[%s3159_s20 + $0x18] sm:$0xff] }
  0xdb   :  { %v3362_v46 = vsel %vm1389_vm13, 1.0, %v3063_v2 }
  0xdc   :  { %v1394_v47 = vpack.c.bf16 %v3362_v46, %v3358_v45  ;;  %v1631_v45 = vld [vmem:[%s3726_s9 + $0x70] sm:$0xff]  ;;  %v1646_v46 = vld [vmem:[%s3726_s9 + $0xe8] sm:$0xff] }
  0xde   :  { %v307_v48 = vpop.permute.xlu1 %306 }
  0xdf   :  { %vm311_vm14 = vcmp.eq.s32.totalorder %v307_v48, %v3304_v15  ;;  %v460_v48 = vpack.c.bf16 %v445_v44, %v444_v41  ;;  %v962_v41 = vld [vmem:[%s3184_s8 + $0x50] sm:$0xff]  ;;  %v963_v44 = vld [vmem:[%s3184_s8 + $0x58] sm:$0xff] }
  0xe0   :  { %v2590_v52 = vsel %vm311_vm14, 1.0, %v3063_v2  ;;  %vm1875_vm14 = vcmask 11264  }
  0xe1   :  { %v317_v0 = vpack.c.bf16 %v2591_v53, %v2590_v52  ;;  %v428_v52 = vpop.permute.xlu0 %427 }
  0xfb   :  { %v217_v50 = vpop.f32.mrf.mxu0  ;;  %v301_v51 = vpop.f32.mrf.mxu1 }
  0xfc   :  { %v234_v54 = vpack.c.bf16 %v217_v50, %v217_v50  ;;  %v318_v55 = vpack.c.bf16 %v301_v51, %v301_v51  ;;  %v443_v50 = vld [vmem:[%s3159_s20 + $0x8] sm:$0xff]  ;;  %s3736_s20 = sld [smem:[#allocation23_spill]] }
  0xfd   :  { %v2755_v58 = vpop.f32.mrf.mxu0  ;;  %v2760_v61 = vpop.f32.mrf.mxu1  ;;  %v459_v51 = vpack.c.bf16 %v443_v50, %v442_v49  ;;  %v515_v49 = vld [vmem:[%s3114_s29] sm:$0xff]  ;;  %s3069_s29 = smov 127  }
  0xfe   :  { %v371_v62 = vsel %vm322_vm4, %v234_v54, 0  ;;  %v324_v63 = vsel %vm322_vm4, %v318_v55, 0  ;;  %v2594_v55 = vld [vmem:[%s3154_s12] ss:$0 sm:$0xff]  ;;  %v436_v61 = vmul.f32 %v2595_v56, %v428_v52  ;;  %s3733_s12 = sld [smem:[#allocation14_spill]] }
  0xff   :  { %2762 = vmatpush3.bf16.msra.mxu0 %v324_v63  ;;  %2768 = vmatpush3.bf16.msra.mxu1 %v371_v62  ;;  %v960_v50 = vld [vmem:[%s3184_s8 + $0x40] sm:$0xff] }
 0x100   :  { %2793 = vmatprep.subr.mxu1 %v3063_v2  ;;  %2773 = vmatprep.subr.bf16.mxu0 %v3063_v2 }
 0x102   :  { %2764 = vmatmul.mubr.msk.bf16.vlgmr.msra.gmra.mxu0 %vm147_vm0, %v317_v0  ;;  %2770 = vmatmul.mubr.msk.bf16.vlgmr.msra.gmra.mxu1 %vm147_vm0, %v233_v1 }
 0x103   :  { %2794 = vmatpush3.msra.mxu1 %v518_v4  ;;  %2795 = vmatprep.mubr.msk.f32.mxu1 %vm3064_vm1, %v3063_v2 }
 0x104   :  { %2798 = vmatprep.subr.mxu1 %v3063_v2  ;;  %2774 = vmatpush3.bf16.msra.mxu0 %v466_v5 }
 0x105   :  { %2775 = vmatprep.subr.bf16.mxu0 %v3063_v2  ;;  %2789 = vmatprep.mubr.msk.bf16.mxu0 %vm3064_vm1, %v3063_v2 }
 0x108   :  { %2776 = vmatpush3.bf16.msra.mxu0 %v465_v10 }
 0x109   :  { %2777 = vmatprep.subr.bf16.mxu0 %v3063_v2 }
 0x10a   :  { %2796 = vmatmul.mubr.msk.f32.vlgmr.msra.gmra.mxu1 %vm147_vm0, %v3261_v3 }
 0x10b   :  { %2799 = vmatpush3.msra.mxu1 %v519_v17  ;;  %2800 = vmatprep.mubr.msk.f32.mxu1 %vm3064_vm1, %v3063_v2 }
 0x10c   :  { %2778 = vmatpush3.bf16.msra.mxu0 %v464_v19  ;;  %2803 = vmatprep.subr.bf16.mxu1 %v3063_v2 }
 0x10d   :  { %2779 = vmatprep.subr.bf16.mxu0 %v3063_v2 }
 0x10e   :  { %2801 = vmatmul.mubr.msk.f32.vlgmr.msra.gmra.mxu1 %vm147_vm0, %v3261_v3 }
 0x10f   :  { %2805 = vmatprep.mubr.msk.bf16.mxu1 %vm3064_vm1, %v3063_v2 }
 0x110   :  { %2780 = vmatpush3.bf16.msra.mxu0 %v463_v24 }
 0x111   :  { %2781 = vmatprep.subr.bf16.mxu0 %v3063_v2 }
 0x114   :  { %2782 = vmatpush3.bf16.msra.mxu0 %v462_v33 }
 0x115   :  { %2783 = vmatprep.subr.bf16.mxu0 %v3063_v2 }
 0x118   :  { %2784 = vmatpush3.bf16.msra.mxu0 %v461_v40 }
 0x119   :  { %2785 = vmatprep.subr.bf16.mxu0 %v3063_v2 }
 0x11c   :  { %2786 = vmatpush3.bf16.msra.mxu0 %v460_v48  ;;  %v974_v48 = vpack.c.bf16 %v963_v44, %v962_v41 }
 0x11d   :  { %2787 = vmatprep.subr.bf16.mxu0 %v3063_v2 }
 0x120   :  { %2788 = vmatpush3.bf16.msra.mxu0 %v459_v51  ;;  %v961_v51 = vld [vmem:[%s3184_s8 + $0x48] sm:$0xff] }
 0x121   :  { %2826 = vmatprep.subr.bf16.mxu0 %v3063_v2 }
 0x1c2   :  { %v360_v53 = vpop.f32.mrf.mxu0  ;;  %v407_v54 = vpop.f32.mrf.mxu1 }
 0x1c3   :  { %v408_v57 = vadd.f32 %v407_v54, %v360_v53 }
 0x1c4   :  { %v2765_v58 = vpop.f32.mrf.mxu0  ;;  %v2771_v59 = vpop.f32.mrf.mxu1 }
 0x1c5   :  { %v421_v60 = vadd.f32 %v2594_v55, %v408_v57 }
 0x1c6   :  { %v363_v62 = vpop.f32.mrf.mxu0  ;;  %v410_v63 = vpop.f32.mrf.mxu1 }
 0x1c7   :  { %v411_v0 = vadd.f32 %v410_v63, %v363_v62  ;;  %v437_v5 = vadd.f32 %v436_v61, %v421_v60 }
 0x1c8   :  { %v2772_v1 = vpop.f32.mrf.mxu1  ;;  %v2766_v4 = vpop.f32.mrf.mxu0 }
 0x1c9   :  { %v422_v8 = vadd.f32 %v2594_v55, %v411_v0  ;;  %v438_v16 = vmax.f32 %v437_v5, 0.0 }
 0x1ca   :  { %v587_v9 = vpop.f32.mrf.mxu1 }
 0x1cb   :  { %v439_v10 = vadd.f32 %v436_v61, %v422_v8  ;;  %v604_v28 = vpack.c.bf16 %v587_v9, %v587_v9  ;;  %v1028_v8 = vld [vmem:[%s3194_s19 + $0x8] sm:$0xff] }
 0x1cc   :  { %v2797_v13 = vpop.f32.mrf.mxu1 }
 0x1cd   :  { %v440_v17 = vmax.f32 %v439_v10, 0.0  ;;  %v740_v34 = vsel %vm322_vm4, %v604_v28, 0  ;;  %v1027_v10 = vld [vmem:[%s3194_s19] sm:$0xff]  ;;  %v1030_v13 = vld [vmem:[%s3194_s19 + $0x18] sm:$0xff] }
 0x1ce   :  { %v671_v19 = vpop.f32.mrf.mxu1  ;;  %v956_v28 = vld [vmem:[%s3184_s8 + $0x20] sm:$0xff] }
 0x1cf   :  { %v441_v20 = vadd.f32 %v440_v17, %v438_v16  ;;  %v688_v23 = vpack.c.bf16 %v671_v19, %v671_v19  ;;  %v1029_v16 = vld [vmem:[%s3194_s19 + $0x10] sm:$0xff] }
 0x1d0   :  { %v2802_v24 = vpop.f32.mrf.mxu1 }
 0x1d1   :  { %v693_v29 = vsel %vm322_vm4, %v688_v23, 0  ;;  %v458_v33 = vpack.c.bf16 %v441_v20, %v441_v20  ;;  %v958_v20 = vld [vmem:[%s3184_s8 + $0x30] sm:$0xff]  ;;  %v959_v23 = vld [vmem:[%s3184_s8 + $0x38] sm:$0xff] }
 0x1d2   :  { %2804 = vmatpush3.bf16.msra.mxu1 %v693_v29  ;;  %v972_v24 = vpack.c.bf16 %v959_v23, %v958_v20  ;;  %v957_v29 = vld [vmem:[%s3184_s8 + $0x28] sm:$0xff]  ;;  %v1031_v20 = vld [vmem:[%s3194_s19 + $0x20] sm:$0xff] }
 0x1d3   :  { %2790 = vmatmul.mubr.bf16.vlgmr.msra.gmra.mxu0 %v458_v33  ;;  %2809 = vmatprep.subr.bf16.mxu1 %v3063_v2  ;;  %v971_v33 = vpack.c.bf16 %v957_v29, %v956_v28 }
 0x1d4   :  { %2842 = vmatprep.mubr.msk.bf16.mxu0 %vm3064_vm1, %v3063_v2  ;;  %2827 = vmatpush3.bf16.msra.mxu0 %v976_v25 }
 0x1d5   :  { %2806 = vmatmul.mubr.msk.bf16.vlgmr.msra.gmra.mxu1 %vm147_vm0, %v687_v22  ;;  %v3068_v22 = vmov 3   ;;  %2828 = vmatprep.subr.bf16.mxu0 %v3063_v2 }
 0x1d6   :  { %2810 = vmatpush3.bf16.msra.mxu1 %v740_v34  ;;  %2811 = vmatprep.mubr.msk.bf16.mxu1 %vm3064_vm1, %v3063_v2  ;;  %v954_v34 = vld [vmem:[%s3184_s8 + $0x10] sm:$0xff] }
 0x1d7   :  { %2815 = vmatprep.subr.mxu1 %v3063_v2  ;;  %2967 = vset.pattern.permute.xlu1 %v3068_v22  ;;  %v953_v22 = vld [vmem:[%s3184_s8 + $0x8] sm:$0xff] }
 0x1d8   :  { %1525 = vperm.xlu1 %2967, %v3288_v12   ;;  %v973_v12 = vpack.c.bf16 %v961_v51, %v960_v50  ;;  %v969_v25 = vpack.c.bf16 %v953_v22, %v952_v21  ;;  %v2608_v50 = vld [vmem:[%s3725_s0] ss:$0 sm:$0xff] }
 0x1dc   :  { %1528 = vperm.xlu1 %2967, %v3285_v11  }
 0x1dd   :  { %2812 = vmatmul.mubr.msk.bf16.vlgmr.msra.gmra.mxu1 %vm147_vm0, %v603_v27  ;;  %v965_v27 = vld [vmem:[%s3184_s8 + $0x68] sm:$0xff] }
 0x1de   :  { %2816 = vmatpush3.msra.mxu1 %v520_v38  ;;  %2817 = vmatprep.mubr.msk.f32.mxu1 %vm3064_vm1, %v3063_v2  ;;  %v975_v40 = vpack.c.bf16 %v965_v27, %v964_v26  ;;  %v955_v38 = vld [vmem:[%s3184_s8 + $0x18] sm:$0xff]  ;;  %v2609_v27 = vld [vmem:[%s3174_s24] ss:$0 sm:$0xff]  ;;  %s3070_s8 = smov 1  }
 0x1df   :  { %2820 = vmatprep.subr.bf16.mxu1 %v3063_v2  ;;  %v970_v18 = vpack.c.bf16 %v955_v38, %v954_v34 }
 0x1e0   :  { %2829 = vmatpush3.bf16.msra.mxu0 %v975_v40  ;;  %2969 = vset.pattern.permute.xlu1 %v3066_v7  ;;  %v2610_v40 = vld [vmem:[%s3174_s24 + $0x1] ss:$0 sm:$0xff]  ;;  %s3071_s24 = smov 126  }
 0x1e1   :  { %2830 = vmatprep.subr.bf16.mxu0 %v3063_v2  ;;  %928 = vperm.xlu1 %2969, %v515_v49  }
 0x1e4   :  { %2831 = vmatpush3.bf16.msra.mxu0 %v974_v48 }
 0x1e5   :  { %2818 = vmatmul.mubr.msk.f32.vlgmr.msra.gmra.mxu1 %vm147_vm0, %v3261_v3  ;;  %2832 = vmatprep.subr.bf16.mxu0 %v3063_v2 }
 0x1e6   :  { %2822 = vmatprep.mubr.msk.bf16.mxu1 %vm3064_vm1, %v3063_v2  ;;  %2970 = vset.pattern.permute.xlu1 %v3065_v6 }
 0x1e7   :  { %938 = vperm.xlu1 %2970, %v515_v49  }
 0x1e8   :  { %2833 = vmatpush3.bf16.msra.mxu0 %v973_v12 }
 0x1e9   :  { %2834 = vmatprep.subr.bf16.mxu0 %v3063_v2 }
 0x1ec   :  { %2835 = vmatpush3.bf16.msra.mxu0 %v972_v24 }
 0x1ed   :  { %2836 = vmatprep.subr.bf16.mxu0 %v3063_v2 }
 0x1f0   :  { %2837 = vmatpush3.bf16.msra.mxu0 %v971_v33 }
 0x1f1   :  { %2838 = vmatprep.subr.bf16.mxu0 %v3063_v2 }
 0x1f4   :  { %2839 = vmatpush3.bf16.msra.mxu0 %v970_v18 }
 0x1f5   :  { %2840 = vmatprep.subr.bf16.mxu0 %v3063_v2 }
 0x1f8   :  { %2841 = vmatpush3.bf16.msra.mxu0 %v969_v25 }
 0x253   :  { %v1526_v17 = vpop.permute.xlu1 %1525 }
 0x254   :  { %vm1530_vm5 = vcmp.eq.s32.totalorder %v1526_v17, %v3304_v15  ;;  %v1032_v17 = vld [vmem:[%s3194_s19 + $0x28] sm:$0xff] }
 0x255   :  { %v3482_v30 = vsel %vm1530_vm5, 1.0, %v3063_v2 }
 0x257   :  { %v1529_v31 = vpop.permute.xlu1 %1528 }
 0x258   :  { %vm1531_vm6 = vcmp.eq.s32.totalorder %v1529_v31, %v3304_v15 }
 0x25c   :  { %v929_v26 = vpop.permute.xlu1 %928 }
 0x25d   :  { %v935_v44 = vmul.f32 %v2609_v27, %v929_v26 }
 0x262   :  { %v939_v41 = vpop.permute.xlu1 %938 }
 0x263   :  { %v945_v48 = vmul.f32 %v2610_v40, %v939_v41  ;;  %v1034_v41 = vld [vmem:[%s3194_s19 + $0x38] sm:$0xff] }
 0x293   :  { %v3463_v11 = vpop.f32.mrf.mxu0 }
 0x295   :  { %v2791_v52 = vpop.f32.mrf.mxu0  ;;  %v729_v53 = vpop.f32.mrf.mxu1 }
 0x296   :  { %v946_v52 = vadd.f32 %v945_v48, %v935_v44  ;;  %v1033_v48 = vld [vmem:[%s3194_s19 + $0x30] sm:$0xff]  ;;  %s3730_s19 = sld [smem:[#allocation9_spill]] }
 0x297   :  { %v512_v54 = vpop.f32.mrf.mxu0  ;;  %v2807_v55 = vpop.f32.mrf.mxu1 }
 0x299   :  { %v2792_v56 = vpop.f32.mrf.mxu0  ;;  %v732_v57 = vpop.f32.mrf.mxu1 }
 0x29b   :  { %v2808_v58 = vpop.f32.mrf.mxu1 }
 0x29d   :  { %v776_v59 = vpop.f32.mrf.mxu1 }
 0x29e   :  { %v777_v60 = vadd.f32 %v776_v59, %v729_v53 }
 0x29f   :  { %v2813_v61 = vpop.f32.mrf.mxu1 }
 0x2a1   :  { %v779_v62 = vpop.f32.mrf.mxu1 }
 0x2a2   :  { %v780_v63 = vadd.f32 %v779_v62, %v732_v57 }
 0x2a3   :  { %v2814_v0 = vpop.f32.mrf.mxu1 }
 0x2a5   :  { %v849_v1 = vpop.f32.mrf.mxu1 }
 0x2a6   :  { %v866_v4 = vpack.c.bf16 %v849_v1, %v849_v1 }
 0x2a7   :  { %v2819_v5 = vpop.f32.mrf.mxu1 }
 0x2a8   :  { %v871_v9 = vsel %vm322_vm4, %v866_v4, 0 }
 0x2a9   :  { %2821 = vmatpush3.bf16.msra.mxu1 %v871_v9 }
 0x2aa   :  { %1065 = vmatprep.subr.mxu1 %v1028_v8 }
 0x2ac   :  { %2823 = vmatmul.mubr.msk.bf16.vlgmr.msra.gmra.mxu1 %vm147_vm0, %v865_v32  ;;  %v3487_v32 = vsel %vm1531_vm6, 1.0, %v3063_v2 }
 0x2ad   :  { %1066 = vmatpush1.msra.mxu1 %v1027_v10  ;;  %1099 = vmatprep.mubr.f32.mxu1 %v3063_v2  ;;  %v1536_v19 = vpack.c.bf16 %v3487_v32, %v3482_v30  ;;  %v1622_v30 = vld [vmem:[%s3726_s9 + $0x28] sm:$0xff]  ;;  %v1637_v32 = vld [vmem:[%s3726_s9 + $0xa0] sm:$0xff] }
 0x2ae   :  { %1151 = vmatprep.subr.mxu1 %v1030_v13 }
 0x2b4   :  { %2611 = vmatmul.mubr.msk.f32.vlgmr.msra.gmra.mxu1 %vm147_vm0, %v3261_v3 }
 0x2b5   :  { %1152 = vmatpush1.msra.mxu1 %v1029_v16  ;;  %1185 = vmatprep.mubr.f32.mxu1 %v3063_v2 }
 0x2b8   :  { %2614 = vmatmul.mubr.msk.f32.vlgmr.msra.gmra.mxu1 %vm147_vm0, %v3261_v3 }
 0x2b9   :  { %1248 = vmatprep.mubr.bf16.mxu1 %v3066_v7 }
 0x36c   :  { %v907_v49 = vpop.f32.mrf.mxu1 }
 0x36d   :  { %v914_v51 = vadd.f32 %v907_v49, %v777_v60  ;;  %v1648_v49 = vld [vmem:[%s3726_s9 + $0xf8] sm:$0xff] }
 0x36e   :  { %v2824_v12 = vpop.f32.mrf.mxu1  ;;  %2691 = vmatprep.subr.mxu0 %v1648_v49 }
 0x36f   :  { %v923_v53 = vadd.f32 %v2608_v50, %v914_v51  ;;  %v1647_v51 = vld [vmem:[%s3726_s9 + $0xf0] sm:$0xff]  ;;  %v1645_v12 = vld [vmem:[%s3726_s9 + $0xe0] sm:$0xff] }
 0x370   :  { %v910_v54 = vpop.f32.mrf.mxu1 }
 0x371   :  { %v915_v55 = vadd.f32 %v910_v54, %v780_v63  ;;  %v947_v57 = vadd.f32 %v946_v52, %v923_v53  ;;  %v1628_v53 = vld [vmem:[%s3726_s9 + $0x58] sm:$0xff]  ;;  %v1643_v54 = vld [vmem:[%s3726_s9 + $0xd0] sm:$0xff] }
 0x372   :  { %v2825_v56 = vpop.f32.mrf.mxu1 }
 0x373   :  { %v924_v58 = vadd.f32 %v2608_v50, %v915_v55  ;;  %v948_v0 = vmax.f32 %v947_v57, 0.0  ;;  %v1632_v50 = vld [vmem:[%s3726_s9 + $0x78] sm:$0xff]  ;;  %v1627_v55 = vld [vmem:[%s3726_s9 + $0x50] sm:$0xff]  ;;  %v1642_v56 = vld [vmem:[%s3726_s9 + $0xc8] sm:$0xff] }
 0x374   :  { %v1101_v59 = vpop.f32.mrf.mxu1  ;;  %v1626_v57 = vld [vmem:[%s3726_s9 + $0x48] sm:$0xff] }
 0x375   :  { %v949_v61 = vadd.f32 %v946_v52, %v924_v58  ;;  %v1119_v13 = vpack.c.bf16 %v1101_v59, %v1101_v59  ;;  %v1644_v52 = vld [vmem:[%s3726_s9 + $0xd8] sm:$0xff]  ;;  %v1641_v58 = vld [vmem:[%s3726_s9 + $0xc0] sm:$0xff] }
 0x376   :  { %v1103_v62 = vpop.f32.mrf.mxu1  ;;  %v1625_v59 = vld [vmem:[%s3726_s9 + $0x40] sm:$0xff] }
 0x377   :  { %v950_v1 = vmax.f32 %v949_v61, 0.0  ;;  %v1120_v16 = vpack.c.bf16 %v1103_v62, %v1103_v62  ;;  %v1263_v31 = vsel %vm322_vm4, %v1119_v13, 0 }
 0x378   :  { %v1187_v4 = vpop.f32.mrf.mxu1 }
 0x379   :  { %v951_v5 = vadd.f32 %v950_v1, %v948_v0  ;;  %v1205_v8 = vpack.c.bf16 %v1187_v4, %v1187_v4 }
 0x37a   :  { %v1189_v9 = vpop.f32.mrf.mxu1 }
 0x37b   :  { %v1206_v60 = vpack.c.bf16 %v1189_v9, %v1189_v9  ;;  %v968_v10 = vpack.c.bf16 %v951_v5, %v951_v5  ;;  %v1211_v63 = vsel %vm322_vm4, %v1205_v8, 0 }
 0x37d   :  { %2843 = vmatmul.mubr.bf16.vlgmr.msra.gmra.mxu0 %v968_v10  ;;  %2617 = vmatprep.subr.msk.bf16.mxu1 %vm322_vm4, %v1206_v60 }
 0x37e   :  { %1231 = vmatpush1.bf16.msra.mxu1 %v1211_v63  ;;  %2692 = vmatpush3.msra.mxu0 %v1632_v50 }
 0x37f   :  { %2619 = vmatprep.subr.msk.bf16.mxu1 %vm322_vm4, %v1120_v16  ;;  %2693 = vmatprep.subr.mxu0 %v1647_v51 }
 0x380   :  { %2694 = vmatpush3.msra.mxu0 %v1631_v45 }
 0x381   :  { %2618 = vmatmul.mubr.msk.bf16.vlgmr.msra.gmra.mxu1 %vm147_vm0, %v1204_v37  ;;  %2695 = vmatprep.subr.mxu0 %v1646_v46 }
 0x382   :  { %1283 = vmatpush1.bf16.msra.mxu1 %v1263_v31  ;;  %1300 = vmatprep.mubr.bf16.mxu1 %v3066_v7  ;;  %v1624_v31 = vld [vmem:[%s3726_s9 + $0x38] sm:$0xff] }
 0x383   :  { %1341 = vmatprep.subr.mxu1 %v1032_v17  ;;  %v1640_v17 = vld [vmem:[%s3726_s9 + $0xb8] sm:$0xff] }
 0x389   :  { %2620 = vmatmul.mubr.msk.bf16.vlgmr.msra.gmra.mxu1 %vm147_vm0, %v1118_v43 }
 0x38a   :  { %1342 = vmatpush1.msra.mxu1 %v1031_v20  ;;  %1375 = vmatprep.mubr.f32.mxu1 %v3063_v2  ;;  %v1639_v20 = vld [vmem:[%s3726_s9 + $0xb0] sm:$0xff] }
 0x391   :  { %2621 = vmatmul.mubr.msk.f32.vlgmr.msra.gmra.mxu1 %vm147_vm0, %v3261_v3 }
 0x392   :  { %1438 = vmatprep.mubr.bf16.mxu1 %v3066_v7 }
 0x43d   :  { %v3524_v35 = vpop.f32.mrf.mxu0 }
 0x43f   :  { %v2844_v36 = vpop.f32.mrf.mxu0 }
 0x440   :  { %v1623_v36 = vld [vmem:[%s3726_s9 + $0x30] sm:$0xff] }
 0x441   :  { %v1022_v37 = vpop.f32.mrf.mxu0  ;;  %v1250_v23 = vpop.f32.mrf.mxu1 }
 0x442   :  { %v1638_v37 = vld [vmem:[%s3726_s9 + $0xa8] sm:$0xff] }
 0x443   :  { %v2845_v24 = vpop.f32.mrf.mxu0  ;;  %v1252_v28 = vpop.f32.mrf.mxu1 }
 0x444   :  { %v1620_v24 = vld [vmem:[%s3726_s9 + $0x18] sm:$0xff] }
 0x445   :  { %v1254_v29 = vpop.f32.mrf.mxu1 }
 0x447   :  { %v1256_v39 = vpop.f32.mrf.mxu1 }
 0x449   :  { %v1302_v42 = vpop.f32.mrf.mxu1 }
 0x44a   :  { %v1303_v43 = vadd.f32 %v1302_v42, %v1250_v23  ;;  %v1636_v23 = vld [vmem:[%s3726_s9 + $0x98] sm:$0xff]  ;;  %v1618_v42 = vld [vmem:[%s3726_s9 + $0x8] sm:$0xff] }
 0x44b   :  { %v1304_v33 = vpop.f32.mrf.mxu1 }
 0x44c   :  { %v1305_v34 = vadd.f32 %v1304_v33, %v1252_v28  ;;  %v1635_v28 = vld [vmem:[%s3726_s9 + $0x90] sm:$0xff]  ;;  %v1617_v33 = vld [vmem:[%s3726_s9] sm:$0xff] }
 0x44d   :  { %v1306_v38 = vpop.f32.mrf.mxu1 }
 0x44e   :  { %v1307_v18 = vadd.f32 %v1306_v38, %v1254_v29  ;;  %v1619_v29 = vld [vmem:[%s3726_s9 + $0x10] sm:$0xff]  ;;  %v1595_v38 = vld [vmem:[%s3727_s13] sm:$0x3] }
 0x44f   :  { %v1308_v21 = vpop.f32.mrf.mxu1 }
 0x450   :  { %v1309_v22 = vadd.f32 %v1308_v21, %v1256_v39  ;;  %v1634_v39 = vld [vmem:[%s3726_s9 + $0x88] sm:$0xff] }
 0x451   :  { %v1377_v25 = vpop.f32.mrf.mxu1 }
 0x452   :  { %v1395_v26 = vpack.c.bf16 %v1377_v25, %v1377_v25 }
 0x453   :  { %v1379_v27 = vpop.f32.mrf.mxu1 }
 0x454   :  { %v1396_v40 = vpack.c.bf16 %v1379_v27, %v1379_v27  ;;  %v1401_v44 = vsel %vm322_vm4, %v1395_v26, 0 }
 0x456   :  { %2624 = vmatprep.subr.msk.bf16.mxu1 %vm322_vm4, %v1396_v40 }
 0x457   :  { %1421 = vmatpush1.bf16.msra.mxu1 %v1401_v44 }
 0x458   :  { %1483 = vmatprep.subr.mxu1 %v1034_v41 }
 0x45a   :  { %2625 = vmatmul.mubr.msk.bf16.vlgmr.msra.gmra.mxu1 %vm147_vm0, %v1394_v47  ;;  %v1630_v47 = vld [vmem:[%s3726_s9 + $0x68] sm:$0xff] }
 0x45b   :  { %1484 = vmatpush1.msra.mxu1 %v1033_v48  ;;  %1517 = vmatprep.mubr.f32.mxu1 %v3063_v2 }
 0x45c   :  { %2696 = vmatpush3.msra.mxu0 %v1630_v47 }
 0x45d   :  { %2697 = vmatprep.subr.mxu0 %v1645_v12 }
 0x462   :  { %2626 = vmatmul.mubr.msk.f32.vlgmr.msra.gmra.mxu1 %vm147_vm0, %v3261_v3  ;;  %v1629_v3 = vld [vmem:[%s3726_s9 + $0x60] sm:$0xff] }
 0x463   :  { %1580 = vmatprep.mubr.bf16.mxu1 %v3066_v7  ;;  %2698 = vmatpush3.msra.mxu0 %v1629_v3 }
 0x464   :  { %2699 = vmatprep.subr.mxu0 %v1644_v52 }
 0x465   :  { %2700 = vmatpush3.msra.mxu0 %v1628_v53 }
 0x466   :  { %2701 = vmatprep.subr.mxu0 %v1643_v54 }
 0x467   :  { %2702 = vmatpush3.msra.mxu0 %v1627_v55  ;;  %v1649_v55 = vld [vmem:[%s3728_s17] sm:$0x1] }
 0x468   :  { %2703 = vmatprep.subr.mxu0 %v1642_v56  ;;  %v1650_v56 = vmul.f32 2.0, %v1649_v55 }
 0x469   :  { %2704 = vmatpush3.msra.mxu0 %v1626_v57 }
 0x46a   :  { %2705 = vmatprep.subr.mxu0 %v1641_v58 }
 0x46b   :  { %2706 = vmatpush3.msra.mxu0 %v1625_v59 }
 0x46c   :  { %2707 = vmatprep.subr.mxu0 %v1640_v17 }
 0x46d   :  { %2708 = vmatpush3.msra.mxu0 %v1624_v31 }
 0x46e   :  { %2709 = vmatprep.subr.mxu0 %v1639_v20 }
 0x46f   :  { %2710 = vmatpush3.msra.mxu0 %v1623_v36 }
 0x470   :  { %2711 = vmatprep.subr.mxu0 %v1638_v37  ;;  %v1752_v37 = vld [vmem:[%s3730_s19] sm:$0xff] }
 0x471   :  { %2712 = vmatpush3.msra.mxu0 %v1622_v30 }
 0x472   :  { %2713 = vmatprep.subr.mxu0 %v1637_v32 }
 0x51a   :  { %v1440_v61 = vpop.f32.mrf.mxu1 }
 0x51b   :  { %v1449_v62 = vadd.f32 %v1440_v61, %v1303_v43  ;;  %v1633_v43 = vld [vmem:[%s3726_s9 + $0x80] sm:$0xff] }
 0x51c   :  { %v1442_v0 = vpop.f32.mrf.mxu1 }
 0x51d   :  { %v1450_v1 = vadd.f32 %v1442_v0, %v1305_v34  ;;  %v3581_v34 = vshrl.u32 %v143_v14, 7 }
 0x51e   :  { %v1444_v4 = vpop.f32.mrf.mxu1 }
 0x51f   :  { %v1451_v5 = vadd.f32 %v1444_v4, %v1307_v18  ;;  %v3585_v18 = vsub.s32 0, %v3581_v34  ;;  %v1603_v21 = vsub.s32 1, %v3581_v34 }
 0x520   :  { %v1446_v8 = vpop.f32.mrf.mxu1 }
 0x521   :  { %v1452_v9 = vadd.f32 %v1446_v8, %v1309_v22  ;;  %v1600_v26 = vrot.slane %v1595_v38, %v3585_v18  ;;  %v1604_v41 = vrot.slane %v1595_v38, %v1603_v21  ;;  %v1655_v58 = vrot.slane %v1650_v56, %v3585_v18 }
 0x522   :  { %v1519_v60 = vpop.f32.mrf.mxu1 }
 0x523   :  { %v1537_v10 = vpack.c.bf16 %v1519_v60, %v1519_v60 }
 0x524   :  { %v1521_v13 = vpop.f32.mrf.mxu1 }
 0x525   :  { %v1538_v16 = vpack.c.bf16 %v1521_v13, %v1521_v13  ;;  %v1543_v63 = vsel %vm322_vm4, %v1537_v10, 0 }
 0x527   :  { %2629 = vmatprep.subr.msk.bf16.mxu1 %vm322_vm4, %v1538_v16 }
 0x528   :  { %1563 = vmatpush1.bf16.msra.mxu1 %v1543_v63 }
 0x529   :  { %2846 = vmatprep.subr.mxu1 %v3063_v2 }
 0x52b   :  { %2630 = vmatmul.mubr.msk.bf16.vlgmr.msra.gmra.mxu1 %vm147_vm0, %v1536_v19  ;;  %v1621_v19 = vld [vmem:[%s3726_s9 + $0x20] sm:$0xff] }
 0x52c   :  { %2848 = vmatprep.mubr.msk.f32.mxu1 %vm3064_vm1, %v3063_v2  ;;  %2714 = vmatpush3.msra.mxu0 %v1621_v19 }
 0x52d   :  { %2715 = vmatprep.subr.mxu0 %v1636_v23 }
 0x52e   :  { %2716 = vmatpush3.msra.mxu0 %v1620_v24 }
 0x52f   :  { %2717 = vmatprep.subr.mxu0 %v1635_v28 }
 0x530   :  { %2718 = vmatpush3.msra.mxu0 %v1619_v29 }
 0x531   :  { %2719 = vmatprep.subr.mxu0 %v1634_v39 }
 0x532   :  { %2720 = vmatpush3.msra.mxu0 %v1618_v42 }
 0x533   :  { %2721 = vmatprep.subr.mxu0 %v1633_v43 }
 0x534   :  { %2722 = vmatpush3.msra.mxu0 %v1617_v33 }
 0x535   :  { %2873 = vmatprep.subr.bf16.mxu0 %v3063_v2 }
 0x5eb   :  { %v1582_v22 = vpop.f32.mrf.mxu1 }
 0x5ec   :  { %v1591_v25 = vadd.f32 %v1582_v22, %v1449_v62 }
 0x5ed   :  { %v1584_v27 = vpop.f32.mrf.mxu1 }
 0x5ee   :  { %v1592_v40 = vadd.f32 %v1584_v27, %v1450_v1  ;;  %v1607_v48 = vadd.f32 %v1600_v26, %v1591_v25 }
 0x5ef   :  { %v1586_v44 = vpop.f32.mrf.mxu1 }
 0x5f0   :  { %v1593_v49 = vadd.f32 %v1586_v44, %v1451_v5  ;;  %v1608_v14 = vadd.f32 %v1604_v41, %v1592_v40  ;;  %v1611_v46 = vmax.f32 %v1607_v48, 0.0  ;;  %v1886_v5 = vld [vmem:[%s3729_s25] sm:$0xff] }
 0x5f1   :  { %v1588_v50 = vpop.f32.mrf.mxu1  ;;  %v1887_v48 = vld [vmem:[%s3732_s6] sm:$0xff] }
 0x5f2   :  { %v1609_v51 = vadd.f32 %v1600_v26, %v1593_v49  ;;  %v1594_v45 = vadd.f32 %v1588_v50, %v1452_v9  ;;  %v1612_v3 = vmax.f32 %v1608_v14, 0.0  ;;  %v2632_v26 = vld [vmem:[%s3731_s30] ss:$0 sm:$0xff] }
 0x5f3   :  { %vm1798_vm13 = vcmp.eq.s32.totalorder %v2632_v26, %v3581_v34 }
 0x5f4   :  { %v1613_v47 = vmax.f32 %v1609_v51, 0.0  ;;  %v1610_v12 = vadd.f32 %v1604_v41, %v1594_v45  ;;  %v2633_v44 = vsel %vm1798_vm13, 1.0, %v3063_v2 }
 0x5f6   :  { %v1615_v52 = vadd.f32 %v1613_v47, %v1611_v46  ;;  %v1614_v53 = vmax.f32 %v1610_v12, 0.0 }
 0x5f8   :  { %v1616_v54 = vadd.f32 %v1614_v53, %v1612_v3  ;;  %v467_v53 = vld [vmem:[%s3733_s12] sm:$0x1] }
 0x5fa   :  { %1721 = vmatprep.mubr.f32.mxu0 %v1616_v54 }
 0x5fb   :  { %1722 = vmatmul.mubr.f32.vlgmr.msra.gmra.mxu0 %v1615_v52 }
 0x5fc   :  { %2889 = vmatprep.mubr.msk.bf16.mxu0 %vm3064_vm1, %v3063_v2 }
 0x6bb   :  { %v2723_v57 = vpop.f32.mrf.mxu0 }
 0x6bd   :  { %v2724_v59 = vpop.f32.mrf.mxu0 }
 0x6be   :  { %v2725_v61 = vadd.f32 %v2724_v59, %v2723_v57 }
 0x6c0   :  { %v1724_v62 = vadd.f32 %v2725_v61, %v1655_v58  ;;  %v468_v58 = vmul.f32 2.0, %v467_v53 }
 0x6c2   :  { %v1727_v0 = vmul.f32 %v1724_v62, %v1724_v62  ;;  %v2631_v24 = vmul.f32 -1.442695, %v1724_v62  ;;  %v473_v61 = vrot.slane %v468_v58, %v3585_v18 }
 0x6c4   :  { %1729 = vrot.lane.b32.xlu0 %v1727_v0, %s3069_s29 }
 0x736   :  { %v1730_v1 = vpop.permute.xlu0 %1729 }
 0x737   :  { %v1733_v4 = vsel %vm1732_vm7, %v1730_v1, 0.0 }
 0x738   :  { %1734 = vadd.xlane.f32.xlu1 %v1733_v4 }
 0x749   :  { %2038 = vperm.xlu1 %2970, %v1886_v5  }
 0x74d   :  { %2501 = vrot.lane.b32.xlu1 %v1724_v62, %s3070_s8 }
 0x7c1   :  { %v1735_v8 = vpop.xlane.xlu1 %1734 }
 0x7c2   :  { %2974 = vrsqrt.f32 %v1735_v8  ;;  %vm1738_vm8 = vcmp.eq.f32.partialorder %v1735_v8, inf  ;;  %v1741_v13 = vand.u32 2147483648, %v1735_v8  ;;  %vm1740_vm10 = vcmp.eq.f32.partialorder %v1735_v8, 0.0 }
 0x7c5   :  { %v3596_v9 = vpop.permute.xlu1 %2038 }
 0x7c6   :  { %vm2040_vm15 = vcmp.eq.s32.totalorder %v3596_v9, %v3304_v15 }
 0x7c7   :  { %v2638_v3 = vsel %vm2040_vm15, 1.0, %v3063_v2 }
 0x7c8   :  { %v2043_v57 = vpack.c.bf16 %v2638_v3, %v2638_v3 }
 0x7c9   :  { %v2502_v31 = vpop.permute.xlu1 %2501 }
 0x7cf   :  { %v2975_v60 = vpop.eup %2974 }
 0x7d0   :  { %v1737_v10 = vmul.f32 %v2975_v60, %v1735_v8  ;;  %v2178_v60 = vld [vmem:[%s3736_s20 + $0x70] sm:$0xff] }
 0x7d2   :  { %v1739_v16 = vsel %vm1738_vm8, %v1735_v8, %v1737_v10  ;;  %v2179_v10 = vld [vmem:[%s3736_s20 + $0x78] sm:$0xff]  ;;  %vm2318_vm8 = vcmask 123904  }
 0x7d3   :  { %v1742_v63 = vsel %vm1740_vm10, %v1741_v13, %v1739_v16  ;;  %v2176_v13 = vld [vmem:[%s3736_s20 + $0x60] sm:$0xff]  ;;  %v2188_v16 = vpack.c.bf16 %v2179_v10, %v2178_v60  ;;  %vm2513_vm10 = vcmask 125952  }
 0x7d4   :  { %v1743_v17 = vmax.f32 %v1742_v63, 1e-12  ;;  %2499 = vst.msk [vmem:[%s3244_s21] sm:$0xff] %vm2498_vm9, %v1742_v63  ;;  %v2177_v63 = vld [vmem:[%s3736_s20 + $0x68] sm:$0xff] }
 0x7d5   :  { %2505 = vst.msk [vmem:[%s3244_s21] sm:$0xff] %vm2504_vm11, %v2502_v31  ;;  %2874 = vmatpush3.bf16.msra.mxu0 %v2188_v16  ;;  %v2175_v31 = vld [vmem:[%s3736_s20 + $0x58] sm:$0xff] }
 0x7d6   :  { %2976 = vrcp.f32 %v1743_v17  ;;  %v2187_v17 = vpack.c.bf16 %v2177_v63, %v2176_v13  ;;  %2875 = vmatprep.subr.bf16.mxu0 %v3063_v2 }
 0x7d7   :  { %2978 = vpow2.f32 %v2631_v24 }
 0x7d9   :  { %2876 = vmatpush3.bf16.msra.mxu0 %v2187_v17 }
 0x7da   :  { %2877 = vmatprep.subr.bf16.mxu0 %v3063_v2 }
 0x7e3   :  { %v2977_v20 = vpop.eup %2976 }
 0x7e4   :  { %v3600_v36 = vmul.f32 %v2977_v20, %v1724_v62  ;;  %v2979_v28 = vpop.eup %2978 }
 0x7e5   :  { %v1749_v29 = vadd.f32 1.0, %v2979_v28  ;;  %v2168_v28 = vld [vmem:[%s3736_s20 + $0x20] sm:$0xff] }
 0x7e6   :  { %1755 = vrot.lane.b32.xlu0 %v3600_v36, %s3069_s29  ;;  %v1764_v43 = vmul.f32 %v1752_v37, %v3600_v36 }
 0x7e7   :  { %2980 = vrcp.f32 %v1749_v29  ;;  %v2169_v29 = vld [vmem:[%s3736_s20 + $0x28] sm:$0xff] }
 0x7ea   :  { %1765 = vrot.lane.b32.xlu0 %v3600_v36, %s3071_s24 }
 0x7f4   :  { %v2981_v21 = vpop.eup %2980 }
 0x858   :  { %v1756_v30 = vpop.permute.xlu0 %1755 }
 0x859   :  { %v1758_v32 = vmul.f32 %v1756_v30, %v1752_v37  ;;  %v2173_v30 = vld [vmem:[%s3736_s20 + $0x48] sm:$0xff] }
 0x85b   :  { %1760 = vrot.lane.b32.xlu0 %v1758_v32, %s3069_s29 }
 0x85c   :  { %v1766_v19 = vpop.permute.xlu0 %1765 }
 0x85d   :  { %v1768_v23 = vmul.f32 %v1766_v19, %v1752_v37  ;;  %v2172_v37 = vld [vmem:[%s3736_s20 + $0x40] sm:$0xff]  ;;  %v2170_v19 = vld [vmem:[%s3736_s20 + $0x30] sm:$0xff] }
 0x85f   :  { %1770 = vrot.lane.b32.xlu0 %v1768_v23, %s3070_s8  ;;  %v2171_v23 = vld [vmem:[%s3736_s20 + $0x38] sm:$0xff] }
 0x860   :  { %v2184_v24 = vpack.c.bf16 %v2171_v23, %v2170_v19 }
 0x8cd   :  { %v1761_v39 = vpop.permute.xlu0 %1760 }
 0x8ce   :  { %v1763_v42 = vsub.f32 %v1758_v32, %v1761_v39  ;;  %v2185_v32 = vpack.c.bf16 %v2173_v30, %v2172_v37  ;;  %v2183_v39 = vpack.c.bf16 %v2169_v29, %v2168_v28 }
 0x8d0   :  { %1776 = vperm.xlu0 %2968, %v1763_v42   ;;  %v2166_v42 = vld [vmem:[%s3736_s20 + $0x10] sm:$0xff] }
 0x8d1   :  { %v1771_v33 = vpop.permute.xlu0 %1770 }
 0x8d2   :  { %v1773_v38 = vadd.f32 %v1771_v33, %v1764_v43  ;;  %v2167_v43 = vld [vmem:[%s3736_s20 + $0x18] sm:$0xff] }
 0x8d3   :  { %v2182_v33 = vpack.c.bf16 %v2167_v43, %v2166_v42 }
 0x8d4   :  { %2971 = vset.pattern.permute.xlu0 %v3065_v6 }
 0x8d5   :  { %1781 = vperm.xlu0 %2971, %v1773_v38   ;;  %v2164_v38 = vld [vmem:[%s3736_s20] sm:$0xff] }
 0x8d9   :  { %2972 = vset.pattern.permute.xlu0 %v3066_v7  ;;  %v2984_v7 = vld [vmem:[%s3084_s5] sm:$0xff]  ;;  %s3734_s5 = sld [smem:[#allocation16_spill]] }
 0x8da   :  { %1787 = vperm.xlu0 %2972, %v2981_v21   ;;  %v2165_v21 = vld [vmem:[%s3736_s20 + $0x8] sm:$0xff] }
 0x8de   :  { %1960 = vperm.xlu0 %2972, %v1886_v5  }
 0x8df   :  { %v977_v0 = vld [vmem:[%s3734_s5] sm:$0x1] }
 0x8e0   :  { %v978_v4 = vmul.f32 2.0, %v977_v0 }
 0x8e2   :  { %2973 = vset.pattern.permute.xlu0 %v3065_v6  ;;  %v1888_v6 = vld [vmem:[%s3732_s6 + $0x8] sm:$0xff]  ;;  %v983_v8 = vrot.slane %v978_v4, %v3585_v18  ;;  %v2189_v4 = vld [vmem:[%s3740_s18] sm:$0x1] }
 0x94b   :  { %v1777_v22 = vpop.permute.xlu0 %1776 }
 0x950   :  { %v1782_v25 = vpop.permute.xlu0 %1781 }
 0x951   :  { %v1784_v27 = vsel %vm1753_vm12, %v1777_v22, %v1782_v25  ;;  %v2181_v22 = vpack.c.bf16 %v2165_v21, %v2164_v38 }
 0x955   :  { %v1788_v40 = vpop.permute.xlu0 %1787 }
 0x956   :  { %v1790_v41 = vmul.f32 %v1788_v40, %v1784_v27 }
 0x958   :  { %2847 = vmatpush3.msra.mxu1 %v1790_v41 }
 0x959   :  { %2849 = vmatmul.mubr.msk.f32.vlgmr.msra.gmra.mxu1 %vm147_vm0, %v2633_v44  ;;  %2851 = vmatprep.subr.mxu1 %v3063_v2  ;;  %v1961_v56 = vpop.permute.xlu0 %1960 }
 0x95a   :  { %2852 = vmatpush3.msra.mxu1 %v1887_v48  ;;  %2853 = vmatprep.mubr.msk.f32.mxu1 %vm3064_vm1, %v3063_v2  ;;  %vm1962_vm2 = vcmp.eq.s32.totalorder %v1961_v56, %v3304_v15  ;;  %v510_v15 = vadd.f32 %v3463_v11, %v473_v61  ;;  %v1020_v11 = vadd.f32 %v3524_v35, %v983_v8  ;;  %v2174_v35 = vld [vmem:[%s3736_s20 + $0x50] sm:$0xff]  ;;  %v2649_v8 = vld [vmem:[%s3741_s22] ss:$0 sm:$0xff] }
 0x95b   :  { %2856 = vmatprep.subr.mxu1 %v3063_v2  ;;  %v2636_v62 = vsel %vm1962_vm2, 1.0, %v3063_v2  ;;  %v2186_v20 = vpack.c.bf16 %v2175_v31, %v2174_v35  ;;  %vm2412_vm9 = vcmp.eq.s32.totalorder %v2649_v8, %v3581_v34 }
 0x95c   :  { %v1965_v1 = vpack.c.bf16 %v2636_v62, %v2636_v62  ;;  %v2646_v62 = vld [vmem:[%s3739_s16] ss:$0 sm:$0xff]  ;;  %v2650_v10 = vsel %vm2412_vm9, 1.0, %v3063_v2 }
 0x95d   :  { %2854 = vmatmul.mubr.msk.f32.vlgmr.msra.gmra.mxu1 %vm147_vm0, %v2984_v7  ;;  %2878 = vmatpush3.bf16.msra.mxu0 %v2186_v20  ;;  %vm2325_vm7 = vcmp.eq.s32.totalorder %v2646_v62, %v3581_v34 }
 0x95e   :  { %2857 = vmatpush3.msra.mxu1 %v1888_v6  ;;  %2858 = vmatprep.mubr.msk.f32.mxu1 %vm3064_vm1, %v3063_v2  ;;  %v2647_v0 = vsel %vm2325_vm7, 1.0, %v3063_v2 }
 0x95f   :  { %2861 = vmatprep.subr.bf16.mxu1 %v3063_v2  ;;  %2879 = vmatprep.subr.bf16.mxu0 %v3063_v2 }
 0x961   :  { %2859 = vmatmul.mubr.msk.f32.vlgmr.msra.gmra.mxu1 %vm147_vm0, %v2984_v7  ;;  %2880 = vmatpush3.bf16.msra.mxu0 %v2185_v32 }
 0x962   :  { %2863 = vmatprep.mubr.msk.bf16.mxu1 %vm3064_vm1, %v3063_v2  ;;  %2881 = vmatprep.subr.bf16.mxu0 %v3063_v2 }
 0x965   :  { %2882 = vmatpush3.bf16.msra.mxu0 %v2184_v24 }
 0x966   :  { %2883 = vmatprep.subr.bf16.mxu0 %v3063_v2 }
 0x969   :  { %2884 = vmatpush3.bf16.msra.mxu0 %v2183_v39 }
 0x96a   :  { %2885 = vmatprep.subr.bf16.mxu0 %v3063_v2 }
 0x96d   :  { %2886 = vmatpush3.bf16.msra.mxu0 %v2182_v33 }
 0x96e   :  { %2887 = vmatprep.subr.bf16.mxu0 %v3063_v2 }
 0x971   :  { %2888 = vmatpush3.bf16.msra.mxu0 %v2181_v22 }
 0xa19   :  { %v1870_v49 = vpop.f32.mrf.mxu1 }
 0xa1a   :  { %v1874_v50 = vmul.f32 %v1870_v49, %v1870_v49  ;;  %2515 = vst.msk [vmem:[%s3254_s14] sm:$0xf] %vm1875_vm14, %v1870_v49  ;;  %s3735_s14 = sld [smem:[#allocation10_spill]]  ;;  %v2642_v49 = vld [vmem:[%s3737_s4] ss:$0 sm:$0xff] }
 0xa1b   :  { %v2850_v14 = vpop.f32.mrf.mxu1 }
 0xa1c   :  { %v1876_v51 = vsel %vm1875_vm14, %v1874_v50, 0.0 }
 0xa1d   :  { %1877 = vadd.xlane.f32.xlu0 %v1876_v51  ;;  %v1955_v45 = vpop.f32.mrf.mxu1 }
 0xa1e   :  { %v1966_v54 = vpack.c.bf16 %v1955_v45, %v1955_v45  ;;  %v2641_v45 = vld [vmem:[%s3738_s15] ss:$0 sm:$0xff] }
 0xa1f   :  { %v2855_v46 = vpop.f32.mrf.mxu1 }
 0xa20   :  { %v2095_v59 = vsel %vm322_vm4, %v1966_v54, 0  ;;  %v2643_v5 = vld [vmem:[%s3735_s14] ss:$0 sm:$0xff] }
 0xa21   :  { %v2033_v47 = vpop.f32.mrf.mxu1  ;;  %vm2242_vm3 = vcmp.eq.s32.totalorder %v2643_v5, %v3581_v34  ;;  %v2190_v5 = vmul.f32 2.0, %v2189_v4 }
 0xa22   :  { %v2044_v12 = vpack.c.bf16 %v2033_v47, %v2033_v47  ;;  %v2644_v9 = vsel %vm2242_vm3, 1.0, %v3063_v2 }
 0xa23   :  { %v2860_v52 = vpop.f32.mrf.mxu1 }
 0xa24   :  { %v2049_v55 = vsel %vm322_vm4, %v2044_v12, 0 }
 0xa25   :  { %2862 = vmatpush3.bf16.msra.mxu1 %v2049_v55 }
 0xa26   :  { %2867 = vmatprep.subr.bf16.mxu1 %v3063_v2 }
 0xa28   :  { %2864 = vmatmul.mubr.msk.bf16.vlgmr.msra.gmra.mxu1 %vm147_vm0, %v2043_v57 }
 0xa29   :  { %2868 = vmatpush3.bf16.msra.mxu1 %v2095_v59  ;;  %2869 = vmatprep.mubr.msk.bf16.mxu1 %vm3064_vm1, %v3063_v2 }
 0xa2a   :  { %2893 = vmatprep.subr.mxu1 %v3063_v2 }
 0xa30   :  { %2870 = vmatmul.mubr.msk.bf16.vlgmr.msra.gmra.mxu1 %vm147_vm0, %v1965_v1 }
 0xa31   :  { %2894 = vmatpush3.msra.mxu1 %v510_v15  ;;  %2895 = vmatprep.mubr.msk.f32.mxu1 %vm3064_vm1, %v3063_v2 }
 0xa32   :  { %2898 = vmatprep.subr.mxu1 %v3063_v2 }
 0xa38   :  { %2896 = vmatmul.mubr.msk.f32.vlgmr.msra.gmra.mxu1 %vm147_vm0, %v2644_v9  ;;  %v2195_v9 = vrot.slane %v2190_v5, %v3585_v18 }
 0xa39   :  { %2899 = vmatpush3.msra.mxu1 %v1020_v11  ;;  %2900 = vmatprep.mubr.msk.f32.mxu1 %vm3064_vm1, %v3063_v2 }
 0xa3a   :  { %2903 = vmatprep.subr.mxu1 %v3063_v2 }
 0xa3c   :  { %2901 = vmatmul.mubr.msk.f32.vlgmr.msra.gmra.mxu1 %vm147_vm0, %v2647_v0  ;;  %vm2415_vm0 = vcmask 31744  }
 0xa3d   :  { %2905 = vmatprep.mubr.msk.f32.mxu1 %vm3064_vm1, %v3063_v2  ;;  %vm2405_vm1 = vcmask 255104  }
 0xaa6   :  { %v1878_v25 = vpop.xlane.xlu0 %1877 }
 0xaa7   :  { %2982 = vrsqrt.f32 %v1878_v25  ;;  %vm1881_vm5 = vcmp.eq.f32.partialorder %v1878_v25, inf  ;;  %v1884_v44 = vand.u32 2147483648, %v1878_v25  ;;  %vm1883_vm6 = vcmp.eq.f32.partialorder %v1878_v25, 0.0 }
 0xab4   :  { %v2983_v26 = vpop.eup %2982 }
 0xab5   :  { %v1880_v27 = vmul.f32 %v2983_v26, %v1878_v25 }
 0xab7   :  { %v1882_v41 = vsel %vm1881_vm5, %v1878_v25, %v1880_v27 }
 0xab8   :  { %v1885_v7 = vsel %vm1883_vm6, %v1884_v44, %v1882_v41 }
 0xab9   :  { %v2152_v14 = vmul.f32 %v2642_v49, %v1885_v7 }
 0xabb   :  { %v2156_v3 = vrot.slane %v2152_v14, 4 }
 0xae8   :  { %v2085_v40 = vpop.f32.mrf.mxu1 }
 0xaea   :  { %v2865_v48 = vpop.f32.mrf.mxu1 }
 0xaec   :  { %v2088_v6 = vpop.f32.mrf.mxu1 }
 0xaee   :  { %v2866_v50 = vpop.f32.mrf.mxu1 }
 0xaf0   :  { %v2131_v51 = vpop.f32.mrf.mxu1 }
 0xaf1   :  { %v2132_v46 = vadd.f32 %v2131_v51, %v2085_v40 }
 0xaf2   :  { %v2871_v47 = vpop.f32.mrf.mxu1 }
 0xaf3   :  { %v2144_v12 = vadd.f32 %v2641_v45, %v2132_v46 }
 0xaf4   :  { %v2134_v52 = vpop.f32.mrf.mxu1 }
 0xaf5   :  { %v2153_v53 = vadd.f32 %v2152_v14, %v2144_v12  ;;  %v2158_v54 = vadd.f32 %v2156_v3, %v2144_v12 }
 0xaf6   :  { %v2872_v55 = vpop.f32.mrf.mxu1 }
 0xaf7   :  { %v2159_v56 = vmax.f32 %v2158_v54, 0.0  ;;  %v2154_v57 = vmax.f32 %v2153_v53, 0.0 }
 0xaf8   :  { %v2314_v1 = vpop.f32.mrf.mxu1 }
 0xaf9   :  { %v2161_v58 = vrot.slane %v2159_v56, 4  ;;  %2319 = vst.msk [vmem:[#allocation2] sm:$0x3] %vm2318_vm8, %v2314_v1 }
 0xafa   :  { %v2897_v15 = vpop.f32.mrf.mxu1 }
 0xafb   :  { %v2163_v59 = vadd.f32 %v2161_v58, %v2154_v57 }
 0xafc   :  { %v2397_v17 = vpop.f32.mrf.mxu1 }
 0xafd   :  { %v2180_v61 = vpack.c.bf16 %v2163_v59, %v2163_v59  ;;  %2402 = vrot.lane.b32.xlu1 %v2397_v17, %s3072_s23 }
 0xafe   :  { %v2902_v35 = vpop.f32.mrf.mxu1 }
 0xaff   :  { %2890 = vmatmul.mubr.bf16.vlgmr.msra.gmra.mxu0 %v2180_v61 }
 0xb6f   :  { %v2403_v18 = vpop.permute.xlu1 %2402 }
 0xb70   :  { %2406 = vst.msk [vmem:[#allocation2] sm:$0x3] %vm2405_vm1, %v2403_v18 }
 0xbbf   :  { %v2231_v11 = vpop.f32.mrf.mxu0 }
 0xbc0   :  { %v2232_v60 = vadd.f32 %v2231_v11, %v2195_v9 }
 0xbc1   :  { %v2891_v13 = vpop.f32.mrf.mxu0 }
 0xbc2   :  { %2904 = vmatpush3.msk.msra.mxu1 %vm322_vm4, %v2232_v60  ;;  %2514 = vst.msk [vmem:[#allocation4] sm:$0xf] %vm2513_vm10, %v2232_v60 }
 0xbc3   :  { %v2234_v16 = vpop.f32.mrf.mxu0  ;;  %2906 = vmatmul.mubr.msk.f32.vlgmr.msra.gmra.mxu1 %vm2415_vm0, %v2650_v10 }
 0xbc5   :  { %v2892_v63 = vpop.f32.mrf.mxu0 }
 0xbc6   :  { %2996 = shalt.err (!%p2993_p4)
}
 0xbc7   :  { %2537 = dma.vmem_to_hbm [thread:$0]  %s2535_s28, 64, %s3249_s27, [#allocation5]   ;;  %vm2496_vm4 = vcmask 386304   ;;  %vm2509_vm11 = vcmask 23568  }
 0xbc8   :  { %s3074_s2 = smov 32   ;;  %s3075_s7 = smov [#allocation2]  }
 0xbc9   :  { %s2522_s10 = sshll.u32 %s3075_s7, 4  ;;  %s2523_s10 = int_to_ptr.vmem [resolvable:$true] %s2522_s10 }
 0xbca   :  { %s3005_s11 = scalar_lea.vmem %s2523_s10, 32  ;;  %p3010_p6 = scmp.lt.s32.totalorder %s2523_s10, %s2523_s10 }
 0xbcb   :  { %p3006_p5 = scmp.ne.s32.totalorder %s2523_s10, %s3005_s11  ;;  %p3011_p7 = scmp.lt.s32.totalorder %s3005_s11, %s3005_s11 }
 0xbcd   :  { %p3012_p8 = por %p3011_p7, %p3010_p6 }
 0xbcf   :  { %p3013_p9 = pnand %p3012_p8, %p3006_p5 }
 0xc83   :  { %v2488_v2 = vpop.f32.mrf.mxu1 }
 0xc84   :  { %2493 = vrot.lane.b32.xlu1 %v2488_v2, %s3074_s2 }
 0xc85   :  { %v2907_v34 = vpop.f32.mrf.mxu1 }
 0xc88   :  { %2506 = vrot.lane.b32.xlu1 %v3600_v36, %s3070_s8 }
 0xcf6   :  { %v2494_v31 = vpop.permute.xlu1 %2493 }
 0xcf7   :  { %2497 = vst.msk [vmem:[#allocation2] sm:$0x3] %vm2496_vm4, %v2494_v31 }
 0xcf8   :  { %3016 = shalt.err (!%p3013_p9)
}
 0xcf9   :  { %2525 = dma.vmem_to_hbm [thread:$0]  %s2523_s10, 32, %s3239_s3, [#allocation3]   ;;  %vm2511_vm12 = vcmask 31768  }
 0xcfa   :  { %v2507_v36 = vpop.permute.xlu1 %2506 }
 0xcfb   :  { %2510 = vst.msk [vmem:[%s3244_s21] sm:$0xff] %vm2509_vm11, %v2507_v36 }
 0xcfc   :  { %2512 = vst.msk [vmem:[%s3244_s21] sm:$0xff] %vm2511_vm12, %v2507_v36 }
 0xcfd   :  { %3025 = dma.done.wait [#allocation3], 32  }
 0xcfe   :  { %3026 = vsyncadd [#allocation3], 4294967264 }
 0xcff   :  { %3027 = dma.done.wait [#allocation5], 64  }
 0xd00   :  { %3028 = vsyncadd [#allocation5], 4294967232 }
 0xd01   :  { %2550 = vsyncpa [#allocation3], 1 }
 0xd02   :  { %2551 = vsyncpa [#allocation5], 1 }

</bundles_post_ra>
